<compile_context>
chip_gen: v5e
topology: v5e:2x2
jax: 0.10.0
libtpu: 0.0.40
codegen_flags: <defaults>
</compile_context>

<pallas_src>
import math
from functools import partial

import jax
import jax.numpy as jnp
from jax import lax
from jax.experimental import pallas as pl
from jax.experimental.pallas import tpu as pltpu

LN_EPS = 1e-5  # torch.nn.LayerNorm default


def _gelu_exact(x):
    # Exact (erf-based) GELU, matching torch.nn.GELU() default.
    return 0.5 * x * (1.0 + lax.erf(x * (1.0 / math.sqrt(2.0))))


def _layer_norm(x, gamma, beta):
    # One-pass statistics: var = E[x^2] - mu^2 (biased, like torch.nn.LayerNorm).
    mu = jnp.mean(x, axis=-1, keepdims=True)
    ms = jnp.mean(x * x, axis=-1, keepdims=True)
    var = ms - mu * mu
    return (x - mu) * lax.rsqrt(var + LN_EPS) * gamma + beta


def mixer_stack_kernel(seq_len, bb, x_ref,
                       ln1g_ref, ln1b_ref, w1t_ref, b1t_ref, w2t_ref, b2t_ref,
                       ln2g_ref, ln2b_ref, w1c_ref, b1c_ref, w2c_ref, b2c_ref,
                       o_ref, act_ref):
    """Grid = (batch_blocks, num_layers).  Activations live in act_ref (f32 VMEM)."""
    layer = pl.program_id(1)
    num_layers = pl.num_programs(1)

    # Load the input activation block once (first layer of this batch block).
    @pl.when(layer == 0)
    def _load_input():
        act_ref[...] = x_ref[...].astype(jnp.float32)

    # Hoist per-layer weights out of the per-batch token loop.
    ln1g = ln1g_ref[...]          # (1, H)
    ln1b = ln1b_ref[...]          # (1, H)
    w1t = w1t_ref[...]            # (Dt, S)  -- PyTorch (out, in)
    b1t = b1t_ref[...]            # (Dt, 1)
    w2t = w2t_ref[...]            # (S, Dt)  -- PyTorch (out, in)
    b2t = b2t_ref[...]            # (S, 1)

    # ---- token-mixing branch: per batch element, (S, H) tiles.
    # Applying the weights from the left keeps everything in (S, H) layout,
    # so no XLU transposes are needed anywhere.
    def _token_mix(b):
        start = b * seq_len
        if seq_len % 8 == 0:
            start = pl.multiple_of(start, 8)
        rows = pl.ds(start, seq_len)
        xb = act_ref[rows, :]                                              # (S, H) f32
        xn = _layer_norm(xb, ln1g, ln1b)                                   # (S, H)
        t = jnp.dot(w1t, xn, preferred_element_type=jnp.float32) + b1t     # (Dt, H)
        t = _gelu_exact(t)
        t = jnp.dot(w2t, t, preferred_element_type=jnp.float32) + b2t      # (S, H)
        act_ref[rows, :] = xb + t                                          # residual

    if bb <= 8:
        # Small, compile-time batch block: full static unroll (LLO visibility).
        for b in range(bb):
            _token_mix(b)
    else:
        pl.loop(0, bb)(_token_mix)

    # ---- channel-mixing branch: batch*seq folded into the MXU M dimension.
    y = act_ref[...]                                                       # (bb*S, H) f32
    yn = _layer_norm(y, ln2g_ref[...], ln2b_ref[...])
    c = jnp.dot(yn, w1c_ref[...], preferred_element_type=jnp.float32) + b1c_ref[...]
    c = _gelu_exact(c)
    c = jnp.dot(c, w2c_ref[...], preferred_element_type=jnp.float32) + b2c_ref[...]
    act_ref[...] = c + y                                                   # residual

    # Write the output block only after the last layer.
    @pl.when(layer == num_layers - 1)
    def _store_output():
        o_ref[...] = act_ref[...].astype(o_ref.dtype)


def mixer_forward(x, params, *, batch_block=None):
    """Apply the full Mixer stack to x of shape (B, S, H)."""
    (ln1g, ln1b, w1t, b1t, w2t, b2t, ln2g, ln2b, w1c, b1c, w2c, b2c) = params
    B, S, H = x.shape
    L = ln1g.shape[0]
    bb = B if batch_block is None else batch_block
    assert B % bb == 0, "batch_block must divide the batch size"
    nb = B // bb
    if nb > 1:
        assert (bb * S) % 8 == 0, "per-block row count should be sublane aligned"

    # Fold batch into the row (sublane) axis outside the kernel (free reshape).
    x2 = x.reshape(B * S, H)

    act_spec = pl.BlockSpec((bb * S, H), lambda nbi, l: (nbi, 0))

    def weight_spec(p):
        # Leading layer dim squeezed; one layer's weights streamed per grid step.
        return pl.BlockSpec((None,) + p.shape[1:], lambda nbi, l: (l, 0, 0))

    in_specs = [act_spec] + [weight_spec(p) for p in params]

    # Explicit VMEM budget: double-buffered per-layer weights, in/out activation
    # blocks, f32 resident activation scratch, plus headroom for intermediates.
    per_layer_w_bytes = sum(p.size // p.shape[0] * p.dtype.itemsize for p in params)
    act_bytes = bb * S * H * x.dtype.itemsize
    dt = w1t.shape[1]
    dc = w1c.shape[2]
    interm_bytes = 4 * bb * S * max(H, dc) * 4 + 4 * max(dt, S) * H * 4
    vmem_est = 2 * per_layer_w_bytes + 4 * act_bytes + bb * S * H * 4 + interm_bytes
    vmem_limit = int(min(max(vmem_est * 3 // 2, 32 * 1024 * 1024), 64 * 1024 * 1024))

    out2 = pl.pallas_call(
        partial(mixer_stack_kernel, S, bb),
        out_shape=jax.ShapeDtypeStruct((B * S, H), x.dtype),
        grid=(nb, L),
        in_specs=in_specs,
        out_specs=act_spec,
        scratch_shapes=[pltpu.VMEM((bb * S, H), jnp.float32)],
        compiler_params=pltpu.CompilerParams(
            dimension_semantics=("parallel", "arbitrary"),
            vmem_limit_bytes=vmem_limit),
    )(x2, *params)
    return out2.reshape(B, S, H)


def init_mixer_params(key, num_mixers, max_seq_len, hidden_dim, mlp_hidden_dim,
                      dtype=jnp.float32):
    """Deterministic synthetic parameters mirroring the PyTorch module shapes."""
    L, S, H, Dm = num_mixers, max_seq_len, hidden_dim, mlp_hidden_dim
    ks = jax.random.split(key, 8)

    def rnd(k, shape, scale):
        return (jax.random.normal(k, shape, jnp.float32) * scale).astype(dtype)

    return (
        jnp.ones((L, 1, H), dtype),                      # ln1 gamma
        jnp.zeros((L, 1, H), dtype),                     # ln1 beta
        rnd(ks[0], (L, Dm, S), 1.0 / math.sqrt(S)),      # token W1 (out, in)
        rnd(ks[1], (L, Dm, 1), 0.02),                    # token b1
        rnd(ks[2], (L, S, Dm), 1.0 / math.sqrt(Dm)),     # token W2 (out, in)
        rnd(ks[3], (L, S, 1), 0.02),                     # token b2
        jnp.ones((L, 1, H), dtype),                      # ln2 gamma
        jnp.zeros((L, 1, H), dtype),                     # ln2 beta
        rnd(ks[4], (L, H, Dm), 1.0 / math.sqrt(H)),      # channel W1 (in, out)
        rnd(ks[5], (L, 1, Dm), 0.02),                    # channel b1
        rnd(ks[6], (L, Dm, H), 1.0 / math.sqrt(Dm)),     # channel W2 (in, out)
        rnd(ks[7], (L, 1, H), 0.02),                     # channel b2
    )


# -------- pure-JAX reference (correctness check only) --------
def _ln_ref(x, gamma, beta):
    mu = jnp.mean(x, axis=-1, keepdims=True)
    var = jnp.mean(jnp.square(x - mu), axis=-1, keepdims=True)
    return (x - mu) / jnp.sqrt(var + LN_EPS) * gamma + beta


def _ref_forward(x, params):
    (ln1g, ln1b, w1t, b1t, w2t, b2t, ln2g, ln2b, w1c, b1c, w2c, b2c) = params
    L = ln1g.shape[0]
    out = x.astype(jnp.float32)
    with jax.default_matmul_precision("highest"):
        for l in range(L):
            xn = _ln_ref(out, ln1g[l, 0], ln1b[l, 0])
            t = jnp.swapaxes(xn, -1, -2)                          # (B, H, S)
            t = t @ w1t[l].T + b1t[l, :, 0]                       # (B, H, Dt)
            t = _gelu_exact(t)
            t = t @ w2t[l].T + b2t[l, :, 0]                       # (B, H, S)
            y = jnp.swapaxes(t, -1, -2) + out                     # (B, S, H)
            yn = _ln_ref(y, ln2g[l, 0], ln2b[l, 0])
            c = _gelu_exact(yn @ w1c[l] + b1c[l, 0]) @ w2c[l] + b2c[l, 0]
            out = c + y
    return out


if __name__ == "__main__":
    # Small shapes consistent with the module: batch=2, seq=8, hidden=32.
    num_mixers = 2
    B, S, H, Dm = 2, 8, 32, 32

    key = jax.random.PRNGKey(0)
    kx, kp = jax.random.split(key)
    x = jax.random.normal(kx, (B, S, H), jnp.float32)
    params = init_mixer_params(kp, num_mixers, S, H, Dm)

    out = mixer_forward(x, params)
    out = jax.block_until_ready(out)

    ref = _ref_forward(x, params)
    assert out.shape == (B, S, H)
    assert jnp.allclose(out, ref, atol=2e-4, rtol=2e-4), \
        "Pallas output mismatch vs JAX reference"

    print("KERNEL_OK")
</pallas_src>

<mosaic_0001>
module attributes {stable_mosaic.version = 11 : i64} {
  func.func @mixer_stack_kernel(%arg0: i32, %arg1: i32, %arg2: memref<16x32xf32, #tpu.memory_space<vmem>>, %arg3: memref<1x1x32xf32, #tpu.memory_space<vmem>>, %arg4: memref<1x1x32xf32, #tpu.memory_space<vmem>>, %arg5: memref<1x32x8xf32, #tpu.memory_space<vmem>>, %arg6: memref<1x32x1xf32, #tpu.memory_space<vmem>>, %arg7: memref<1x8x32xf32, #tpu.memory_space<vmem>>, %arg8: memref<1x8x1xf32, #tpu.memory_space<vmem>>, %arg9: memref<1x1x32xf32, #tpu.memory_space<vmem>>, %arg10: memref<1x1x32xf32, #tpu.memory_space<vmem>>, %arg11: memref<1x32x32xf32, #tpu.memory_space<vmem>>, %arg12: memref<1x1x32xf32, #tpu.memory_space<vmem>>, %arg13: memref<1x32x32xf32, #tpu.memory_space<vmem>>, %arg14: memref<1x1x32xf32, #tpu.memory_space<vmem>>, %arg15: memref<16x32xf32, #tpu.memory_space<vmem>>, %arg16: memref<16x32xf32, #tpu.memory_space<vmem>>) attributes {dimension_semantics = [#tpu.dimension_semantics<parallel>, #tpu.dimension_semantics<arbitrary>], iteration_bounds = array<i64: 1, 2>, scalar_prefetch = 0 : i64, scratch_operands = 1 : i64, tpu.core_type = #tpu.core_type<tc>, window_params = [{transform_indices = @transform_0, window_bounds = array<i64: 16, 32>}, {transform_indices = @transform_1, window_bounds = array<i64: 1, 1, 32>}, {transform_indices = @transform_2, window_bounds = array<i64: 1, 1, 32>}, {transform_indices = @transform_3, window_bounds = array<i64: 1, 32, 8>}, {transform_indices = @transform_4, window_bounds = array<i64: 1, 32, 1>}, {transform_indices = @transform_5, window_bounds = array<i64: 1, 8, 32>}, {transform_indices = @transform_6, window_bounds = array<i64: 1, 8, 1>}, {transform_indices = @transform_7, window_bounds = array<i64: 1, 1, 32>}, {transform_indices = @transform_8, window_bounds = array<i64: 1, 1, 32>}, {transform_indices = @transform_9, window_bounds = array<i64: 1, 32, 32>}, {transform_indices = @transform_10, window_bounds = array<i64: 1, 1, 32>}, {transform_indices = @transform_11, window_bounds = array<i64: 1, 32, 32>}, {transform_indices = @transform_12, window_bounds = array<i64: 1, 1, 32>}, {transform_indices = @transform_13, window_bounds = array<i64: 16, 32>}]} {
    %c0_i32 = arith.constant 0 : i32
    %0 = arith.cmpi eq, %arg1, %c0_i32 : i32
    %1 = arith.extui %0 : i1 to i32
    %c0_i32_0 = arith.constant 0 : i32
    %2 = arith.cmpi ne, %1, %c0_i32_0 : i32
    scf.if %2 {
      %c0_75 = arith.constant 0 : index
      %c0_76 = arith.constant 0 : index
      %153 = vector.load %arg2[%c0_75, %c0_76] : memref<16x32xf32, #tpu.memory_space<vmem>>, vector<16x32xf32>
      %c0_77 = arith.constant 0 : index
      %c0_78 = arith.constant 0 : index
      %154 = vector.load %arg16[%c0_77, %c0_78] : memref<16x32xf32, #tpu.memory_space<vmem>>, vector<16x32xf32>
      tpu.vector_store %arg16[%c0_77, %c0_78], %153 {strides = array<i32>} : memref<16x32xf32, #tpu.memory_space<vmem>>, vector<16x32xf32>,
    } else {
    }
    %c0 = arith.constant 0 : index
    %c0_1 = arith.constant 0 : index
    %c0_2 = arith.constant 0 : index
    %3 = vector.load %arg3[%c0, %c0_1, %c0_2] : memref<1x1x32xf32, #tpu.memory_space<vmem>>, vector<1x1x32xf32>
    %4 = vector.shape_cast %3 : vector<1x1x32xf32> to vector<1x32xf32>
    %c0_3 = arith.constant 0 : index
    %c0_4 = arith.constant 0 : index
    %c0_5 = arith.constant 0 : index
    %5 = vector.load %arg4[%c0_3, %c0_4, %c0_5] : memref<1x1x32xf32, #tpu.memory_space<vmem>>, vector<1x1x32xf32>
    %6 = vector.shape_cast %5 : vector<1x1x32xf32> to vector<1x32xf32>
    %c0_6 = arith.constant 0 : index
    %c0_7 = arith.constant 0 : index
    %c0_8 = arith.constant 0 : index
    %7 = vector.load %arg5[%c0_6, %c0_7, %c0_8] : memref<1x32x8xf32, #tpu.memory_space<vmem>>, vector<1x32x8xf32>
    %8 = vector.shape_cast %7 : vector<1x32x8xf32> to vector<32x8xf32>
    %c0_9 = arith.constant 0 : index
    %c0_10 = arith.constant 0 : index
    %c0_11 = arith.constant 0 : index
    %9 = vector.load %arg6[%c0_9, %c0_10, %c0_11] : memref<1x32x1xf32, #tpu.memory_space<vmem>>, vector<1x32x1xf32>
    %10 = vector.shape_cast %9 : vector<1x32x1xf32> to vector<32x1xf32>
    %c0_12 = arith.constant 0 : index
    %c0_13 = arith.constant 0 : index
    %c0_14 = arith.constant 0 : index
    %11 = vector.load %arg7[%c0_12, %c0_13, %c0_14] : memref<1x8x32xf32, #tpu.memory_space<vmem>>, vector<1x8x32xf32>
    %12 = vector.shape_cast %11 : vector<1x8x32xf32> to vector<8x32xf32>
    %c0_15 = arith.constant 0 : index
    %c0_16 = arith.constant 0 : index
    %c0_17 = arith.constant 0 : index
    %13 = vector.load %arg8[%c0_15, %c0_16, %c0_17] : memref<1x8x1xf32, #tpu.memory_space<vmem>>, vector<1x8x1xf32>
    %14 = vector.shape_cast %13 : vector<1x8x1xf32> to vector<8x1xf32>
    %c0_i32_18 = arith.constant 0 : i32
    %15 = tpu.assume_multiple %c0_i32_18, 8 : i32
    %16 = arith.index_cast %15 : i32 to index
    %c0_19 = arith.constant 0 : index
    %17 = vector.load %arg16[%16, %c0_19] : memref<16x32xf32, #tpu.memory_space<vmem>>, vector<8x32xf32>
    %cst = arith.constant dense<0.000000e+00> : vector<8xf32>
    %18 = vector.multi_reduction <add>, %17, %cst [1] : vector<8x32xf32> to vector<8xf32>
    %19 = vector.shape_cast %18 : vector<8xf32> to vector<8x1xf32>
    %cst_20 = arith.constant 3.200000e+01 : f32
    %20 = vector.broadcast %cst_20 : f32 to vector<8x1xf32>
    %21 = arith.divf %19, %20 : vector<8x1xf32>
    %22 = arith.mulf %17, %17 : vector<8x32xf32>
    %cst_21 = arith.constant dense<0.000000e+00> : vector<8xf32>
    %23 = vector.multi_reduction <add>, %22, %cst_21 [1] : vector<8x32xf32> to vector<8xf32>
    %24 = vector.shape_cast %23 : vector<8xf32> to vector<8x1xf32>
    %cst_22 = arith.constant 3.200000e+01 : f32
    %25 = vector.broadcast %cst_22 : f32 to vector<8x1xf32>
    %26 = arith.divf %24, %25 : vector<8x1xf32>
    %27 = arith.mulf %21, %21 : vector<8x1xf32>
    %28 = arith.subf %26, %27 : vector<8x1xf32>
    %29 = vector.broadcast %21 : vector<8x1xf32> to vector<8x32xf32>
    %30 = arith.subf %17, %29 : vector<8x32xf32>
    %cst_23 = arith.constant 9.99999974E-6 : f32
    %31 = vector.broadcast %cst_23 : f32 to vector<8x1xf32>
    %32 = arith.addf %28, %31 : vector<8x1xf32>
    %33 = math.rsqrt %32 : vector<8x1xf32>
    %34 = vector.broadcast %33 : vector<8x1xf32> to vector<8x32xf32>
    %35 = arith.mulf %30, %34 : vector<8x32xf32>
    %36 = vector.broadcast %4 : vector<1x32xf32> to vector<8x32xf32>
    %37 = arith.mulf %35, %36 : vector<8x32xf32>
    %38 = vector.broadcast %6 : vector<1x32xf32> to vector<8x32xf32>
    %39 = arith.addf %37, %38 : vector<8x32xf32>
    %cst_24 = arith.constant dense<0.000000e+00> : vector<32x32xf32>
    %40 = tpu.matmul %8, %39, %cst_24 {dimension_numbers = #tpu.dot_dimension_numbers<[1], [0], [0], [1], [0, 0, 1, 1], [], []>} : vector<32x8xf32>, vector<8x32xf32>, vector<32x32xf32> -> vector<32x32xf32>
    %41 = vector.broadcast %10 : vector<32x1xf32> to vector<32x32xf32>
    %42 = arith.addf %40, %41 : vector<32x32xf32>
    %cst_25 = arith.constant 5.000000e-01 : f32
    %43 = vector.broadcast %cst_25 : f32 to vector<32x32xf32>
    %44 = arith.mulf %43, %42 : vector<32x32xf32>
    %cst_26 = arith.constant 0.707106769 : f32
    %45 = vector.broadcast %cst_26 : f32 to vector<32x32xf32>
    %46 = arith.mulf %42, %45 : vector<32x32xf32>
    %47 = math.erf %46 : vector<32x32xf32>
    %cst_27 = arith.constant 1.000000e+00 : f32
    %48 = vector.broadcast %cst_27 : f32 to vector<32x32xf32>
    %49 = arith.addf %48, %47 : vector<32x32xf32>
    %50 = arith.mulf %44, %49 : vector<32x32xf32>
    %cst_28 = arith.constant dense<0.000000e+00> : vector<8x32xf32>
    %51 = tpu.matmul %12, %50, %cst_28 {dimension_numbers = #tpu.dot_dimension_numbers<[1], [0], [0], [1], [0, 0, 1, 1], [], []>} : vector<8x32xf32>, vector<32x32xf32>, vector<8x32xf32> -> vector<8x32xf32>
    %52 = vector.broadcast %14 : vector<8x1xf32> to vector<8x32xf32>
    %53 = arith.addf %51, %52 : vector<8x32xf32>
    %54 = arith.addf %17, %53 : vector<8x32xf32>
    %55 = arith.index_cast %15 : i32 to index
    %c0_29 = arith.constant 0 : index
    %56 = vector.load %arg16[%55, %c0_29] : memref<16x32xf32, #tpu.memory_space<vmem>>, vector<8x32xf32>
    tpu.vector_store %arg16[%55, %c0_29], %54 {strides = array<i32>} : memref<16x32xf32, #tpu.memory_space<vmem>>, vector<8x32xf32>,
    %c8_i32 = arith.constant 8 : i32
    %57 = tpu.assume_multiple %c8_i32, 8 : i32
    %58 = arith.index_cast %57 : i32 to index
    %c0_30 = arith.constant 0 : index
    %59 = vector.load %arg16[%58, %c0_30] : memref<16x32xf32, #tpu.memory_space<vmem>>, vector<8x32xf32>
    %cst_31 = arith.constant dense<0.000000e+00> : vector<8xf32>
    %60 = vector.multi_reduction <add>, %59, %cst_31 [1] : vector<8x32xf32> to vector<8xf32>
    %61 = vector.shape_cast %60 : vector<8xf32> to vector<8x1xf32>
    %cst_32 = arith.constant 3.200000e+01 : f32
    %62 = vector.broadcast %cst_32 : f32 to vector<8x1xf32>
    %63 = arith.divf %61, %62 : vector<8x1xf32>
    %64 = arith.mulf %59, %59 : vector<8x32xf32>
    %cst_33 = arith.constant dense<0.000000e+00> : vector<8xf32>
    %65 = vector.multi_reduction <add>, %64, %cst_33 [1] : vector<8x32xf32> to vector<8xf32>
    %66 = vector.shape_cast %65 : vector<8xf32> to vector<8x1xf32>
    %cst_34 = arith.constant 3.200000e+01 : f32
    %67 = vector.broadcast %cst_34 : f32 to vector<8x1xf32>
    %68 = arith.divf %66, %67 : vector<8x1xf32>
    %69 = arith.mulf %63, %63 : vector<8x1xf32>
    %70 = arith.subf %68, %69 : vector<8x1xf32>
    %71 = vector.broadcast %63 : vector<8x1xf32> to vector<8x32xf32>
    %72 = arith.subf %59, %71 : vector<8x32xf32>
    %cst_35 = arith.constant 9.99999974E-6 : f32
    %73 = vector.broadcast %cst_35 : f32 to vector<8x1xf32>
    %74 = arith.addf %70, %73 : vector<8x1xf32>
    %75 = math.rsqrt %74 : vector<8x1xf32>
    %76 = vector.broadcast %75 : vector<8x1xf32> to vector<8x32xf32>
    %77 = arith.mulf %72, %76 : vector<8x32xf32>
    %78 = vector.broadcast %4 : vector<1x32xf32> to vector<8x32xf32>
    %79 = arith.mulf %77, %78 : vector<8x32xf32>
    %80 = vector.broadcast %6 : vector<1x32xf32> to vector<8x32xf32>
    %81 = arith.addf %79, %80 : vector<8x32xf32>
    %cst_36 = arith.constant dense<0.000000e+00> : vector<32x32xf32>
    %82 = tpu.matmul %8, %81, %cst_36 {dimension_numbers = #tpu.dot_dimension_numbers<[1], [0], [0], [1], [0, 0, 1, 1], [], []>} : vector<32x8xf32>, vector<8x32xf32>, vector<32x32xf32> -> vector<32x32xf32>
    %83 = vector.broadcast %10 : vector<32x1xf32> to vector<32x32xf32>
    %84 = arith.addf %82, %83 : vector<32x32xf32>
    %cst_37 = arith.constant 5.000000e-01 : f32
    %85 = vector.broadcast %cst_37 : f32 to vector<32x32xf32>
    %86 = arith.mulf %85, %84 : vector<32x32xf32>
    %cst_38 = arith.constant 0.707106769 : f32
    %87 = vector.broadcast %cst_38 : f32 to vector<32x32xf32>
    %88 = arith.mulf %84, %87 : vector<32x32xf32>
    %89 = math.erf %88 : vector<32x32xf32>
    %cst_39 = arith.constant 1.000000e+00 : f32
    %90 = vector.broadcast %cst_39 : f32 to vector<32x32xf32>
    %91 = arith.addf %90, %89 : vector<32x32xf32>
    %92 = arith.mulf %86, %91 : vector<32x32xf32>
    %cst_40 = arith.constant dense<0.000000e+00> : vector<8x32xf32>
    %93 = tpu.matmul %12, %92, %cst_40 {dimension_numbers = #tpu.dot_dimension_numbers<[1], [0], [0], [1], [0, 0, 1, 1], [], []>} : vector<8x32xf32>, vector<32x32xf32>, vector<8x32xf32> -> vector<8x32xf32>
    %94 = vector.broadcast %14 : vector<8x1xf32> to vector<8x32xf32>
    %95 = arith.addf %93, %94 : vector<8x32xf32>
    %96 = arith.addf %59, %95 : vector<8x32xf32>
    %97 = arith.index_cast %57 : i32 to index
    %c0_41 = arith.constant 0 : index
    %98 = vector.load %arg16[%97, %c0_41] : memref<16x32xf32, #tpu.memory_space<vmem>>, vector<8x32xf32>
    tpu.vector_store %arg16[%97, %c0_41], %96 {strides = array<i32>} : memref<16x32xf32, #tpu.memory_space<vmem>>, vector<8x32xf32>,
    %c0_42 = arith.constant 0 : index
    %c0_43 = arith.constant 0 : index
    %99 = vector.load %arg16[%c0_42, %c0_43] : memref<16x32xf32, #tpu.memory_space<vmem>>, vector<16x32xf32>
    %c0_44 = arith.constant 0 : index
    %c0_45 = arith.constant 0 : index
    %c0_46 = arith.constant 0 : index
    %100 = vector.load %arg9[%c0_44, %c0_45, %c0_46] : memref<1x1x32xf32, #tpu.memory_space<vmem>>, vector<1x1x32xf32>
    %101 = vector.shape_cast %100 : vector<1x1x32xf32> to vector<1x32xf32>
    %c0_47 = arith.constant 0 : index
    %c0_48 = arith.constant 0 : index
    %c0_49 = arith.constant 0 : index
    %102 = vector.load %arg10[%c0_47, %c0_48, %c0_49] : memref<1x1x32xf32, #tpu.memory_space<vmem>>, vector<1x1x32xf32>
    %103 = vector.shape_cast %102 : vector<1x1x32xf32> to vector<1x32xf32>
    %cst_50 = arith.constant dense<0.000000e+00> : vector<16xf32>
    %104 = vector.multi_reduction <add>, %99, %cst_50 [1] : vector<16x32xf32> to vector<16xf32>
    %105 = vector.shape_cast %104 : vector<16xf32> to vector<16x1xf32>
    %cst_51 = arith.constant 3.200000e+01 : f32
    %106 = vector.broadcast %cst_51 : f32 to vector<16x1xf32>
    %107 = arith.divf %105, %106 : vector<16x1xf32>
    %108 = arith.mulf %99, %99 : vector<16x32xf32>
    %cst_52 = arith.constant dense<0.000000e+00> : vector<16xf32>
    %109 = vector.multi_reduction <add>, %108, %cst_52 [1] : vector<16x32xf32> to vector<16xf32>
    %110 = vector.shape_cast %109 : vector<16xf32> to vector<16x1xf32>
    %cst_53 = arith.constant 3.200000e+01 : f32
    %111 = vector.broadcast %cst_53 : f32 to vector<16x1xf32>
    %112 = arith.divf %110, %111 : vector<16x1xf32>
    %113 = arith.mulf %107, %107 : vector<16x1xf32>
    %114 = arith.subf %112, %113 : vector<16x1xf32>
    %115 = vector.broadcast %107 : vector<16x1xf32> to vector<16x32xf32>
    %116 = arith.subf %99, %115 : vector<16x32xf32>
    %cst_54 = arith.constant 9.99999974E-6 : f32
    %117 = vector.broadcast %cst_54 : f32 to vector<16x1xf32>
    %118 = arith.addf %114, %117 : vector<16x1xf32>
    %119 = math.rsqrt %118 : vector<16x1xf32>
    %120 = vector.broadcast %119 : vector<16x1xf32> to vector<16x32xf32>
    %121 = arith.mulf %116, %120 : vector<16x32xf32>
    %122 = vector.broadcast %101 : vector<1x32xf32> to vector<16x32xf32>
    %123 = arith.mulf %121, %122 : vector<16x32xf32>
    %124 = vector.broadcast %103 : vector<1x32xf32> to vector<16x32xf32>
    %125 = arith.addf %123, %124 : vector<16x32xf32>
    %c0_55 = arith.constant 0 : index
    %c0_56 = arith.constant 0 : index
    %c0_57 = arith.constant 0 : index
    %126 = vector.load %arg11[%c0_55, %c0_56, %c0_57] : memref<1x32x32xf32, #tpu.memory_space<vmem>>, vector<1x32x32xf32>
    %127 = vector.shape_cast %126 : vector<1x32x32xf32> to vector<32x32xf32>
    %cst_58 = arith.constant dense<0.000000e+00> : vector<16x32xf32>
    %128 = tpu.matmul %125, %127, %cst_58 {dimension_numbers = #tpu.dot_dimension_numbers<[1], [0], [0], [1], [0, 0, 1, 1], [], []>} : vector<16x32xf32>, vector<32x32xf32>, vector<16x32xf32> -> vector<16x32xf32>
    %c0_59 = arith.constant 0 : index
    %c0_60 = arith.constant 0 : index
    %c0_61 = arith.constant 0 : index
    %129 = vector.load %arg12[%c0_59, %c0_60, %c0_61] : memref<1x1x32xf32, #tpu.memory_space<vmem>>, vector<1x1x32xf32>
    %130 = vector.shape_cast %129 : vector<1x1x32xf32> to vector<1x32xf32>
    %131 = vector.broadcast %130 : vector<1x32xf32> to vector<16x32xf32>
    %132 = arith.addf %128, %131 : vector<16x32xf32>
    %cst_62 = arith.constant 5.000000e-01 : f32
    %133 = vector.broadcast %cst_62 : f32 to vector<16x32xf32>
    %134 = arith.mulf %133, %132 : vector<16x32xf32>
    %cst_63 = arith.constant 0.707106769 : f32
    %135 = vector.broadcast %cst_63 : f32 to vector<16x32xf32>
    %136 = arith.mulf %132, %135 : vector<16x32xf32>
    %137 = math.erf %136 : vector<16x32xf32>
    %cst_64 = arith.constant 1.000000e+00 : f32
    %138 = vector.broadcast %cst_64 : f32 to vector<16x32xf32>
    %139 = arith.addf %138, %137 : vector<16x32xf32>
    %140 = arith.mulf %134, %139 : vector<16x32xf32>
    %c0_65 = arith.constant 0 : index
    %c0_66 = arith.constant 0 : index
    %c0_67 = arith.constant 0 : index
    %141 = vector.load %arg13[%c0_65, %c0_66, %c0_67] : memref<1x32x32xf32, #tpu.memory_space<vmem>>, vector<1x32x32xf32>
    %142 = vector.shape_cast %141 : vector<1x32x32xf32> to vector<32x32xf32>
    %cst_68 = arith.constant dense<0.000000e+00> : vector<16x32xf32>
    %143 = tpu.matmul %140, %142, %cst_68 {dimension_numbers = #tpu.dot_dimension_numbers<[1], [0], [0], [1], [0, 0, 1, 1], [], []>} : vector<16x32xf32>, vector<32x32xf32>, vector<16x32xf32> -> vector<16x32xf32>
    %c0_69 = arith.constant 0 : index
    %c0_70 = arith.constant 0 : index
    %c0_71 = arith.constant 0 : index
    %144 = vector.load %arg14[%c0_69, %c0_70, %c0_71] : memref<1x1x32xf32, #tpu.memory_space<vmem>>, vector<1x1x32xf32>
    %145 = vector.shape_cast %144 : vector<1x1x32xf32> to vector<1x32xf32>
    %146 = vector.broadcast %145 : vector<1x32xf32> to vector<16x32xf32>
    %147 = arith.addf %143, %146 : vector<16x32xf32>
    %148 = arith.addf %147, %99 : vector<16x32xf32>
    %c0_72 = arith.constant 0 : index
    %c0_73 = arith.constant 0 : index
    %149 = vector.load %arg16[%c0_72, %c0_73] : memref<16x32xf32, #tpu.memory_space<vmem>>, vector<16x32xf32>
    tpu.vector_store %arg16[%c0_72, %c0_73], %148 {strides = array<i32>} : memref<16x32xf32, #tpu.memory_space<vmem>>, vector<16x32xf32>,
    %c1_i32 = arith.constant 1 : i32
    %150 = arith.cmpi eq, %arg1, %c1_i32 : i32
    %151 = arith.extui %150 : i1 to i32
    %c0_i32_74 = arith.constant 0 : i32
    %152 = arith.cmpi ne, %151, %c0_i32_74 : i32
    scf.if %152 {
      %c0_75 = arith.constant 0 : index
      %c0_76 = arith.constant 0 : index
      %153 = vector.load %arg16[%c0_75, %c0_76] : memref<16x32xf32, #tpu.memory_space<vmem>>, vector<16x32xf32>
      %c0_77 = arith.constant 0 : index
      %c0_78 = arith.constant 0 : index
      %154 = vector.load %arg15[%c0_77, %c0_78] : memref<16x32xf32, #tpu.memory_space<vmem>>, vector<16x32xf32>
      tpu.vector_store %arg15[%c0_77, %c0_78], %153 {strides = array<i32>} : memref<16x32xf32, #tpu.memory_space<vmem>>, vector<16x32xf32>,
    } else {
    }
    return
  }
  func.func @transform_0(%arg0: i32, %arg1: i32) -> (i32, i32) {
    %c0_i32 = arith.constant 0 : i32
    %c0_i32_0 = arith.constant 0 : i32
    return %arg0, %c0_i32 : i32, i32
  }
  func.func @transform_1(%arg0: i32, %arg1: i32) -> (i32, i32, i32) {
    %c0_i32 = arith.constant 0 : i32
    %c0_i32_0 = arith.constant 0 : i32
    %c0_i32_1 = arith.constant 0 : i32
    return %arg1, %c0_i32, %c0_i32_0 : i32, i32, i32
  }
  func.func @transform_2(%arg0: i32, %arg1: i32) -> (i32, i32, i32) {
    %c0_i32 = arith.constant 0 : i32
    %c0_i32_0 = arith.constant 0 : i32
    %c0_i32_1 = arith.constant 0 : i32
    return %arg1, %c0_i32, %c0_i32_0 : i32, i32, i32
  }
  func.func @transform_3(%arg0: i32, %arg1: i32) -> (i32, i32, i32) {
    %c0_i32 = arith.constant 0 : i32
    %c0_i32_0 = arith.constant 0 : i32
    %c0_i32_1 = arith.constant 0 : i32
    return %arg1, %c0_i32, %c0_i32_0 : i32, i32, i32
  }
  func.func @transform_4(%arg0: i32, %arg1: i32) -> (i32, i32, i32) {
    %c0_i32 = arith.constant 0 : i32
    %c0_i32_0 = arith.constant 0 : i32
    %c0_i32_1 = arith.constant 0 : i32
    return %arg1, %c0_i32, %c0_i32_0 : i32, i32, i32
  }
  func.func @transform_5(%arg0: i32, %arg1: i32) -> (i32, i32, i32) {
    %c0_i32 = arith.constant 0 : i32
    %c0_i32_0 = arith.constant 0 : i32
    %c0_i32_1 = arith.constant 0 : i32
    return %arg1, %c0_i32, %c0_i32_0 : i32, i32, i32
  }
  func.func @transform_6(%arg0: i32, %arg1: i32) -> (i32, i32, i32) {
    %c0_i32 = arith.constant 0 : i32
    %c0_i32_0 = arith.constant 0 : i32
    %c0_i32_1 = arith.constant 0 : i32
    return %arg1, %c0_i32, %c0_i32_0 : i32, i32, i32
  }
  func.func @transform_7(%arg0: i32, %arg1: i32) -> (i32, i32, i32) {
    %c0_i32 = arith.constant 0 : i32
    %c0_i32_0 = arith.constant 0 : i32
    %c0_i32_1 = arith.constant 0 : i32
    return %arg1, %c0_i32, %c0_i32_0 : i32, i32, i32
  }
  func.func @transform_8(%arg0: i32, %arg1: i32) -> (i32, i32, i32) {
    %c0_i32 = arith.constant 0 : i32
    %c0_i32_0 = arith.constant 0 : i32
    %c0_i32_1 = arith.constant 0 : i32
    return %arg1, %c0_i32, %c0_i32_0 : i32, i32, i32
  }
  func.func @transform_9(%arg0: i32, %arg1: i32) -> (i32, i32, i32) {
    %c0_i32 = arith.constant 0 : i32
    %c0_i32_0 = arith.constant 0 : i32
    %c0_i32_1 = arith.constant 0 : i32
    return %arg1, %c0_i32, %c0_i32_0 : i32, i32, i32
  }
  func.func @transform_10(%arg0: i32, %arg1: i32) -> (i32, i32, i32) {
    %c0_i32 = arith.constant 0 : i32
    %c0_i32_0 = arith.constant 0 : i32
    %c0_i32_1 = arith.constant 0 : i32
    return %arg1, %c0_i32, %c0_i32_0 : i32, i32, i32
  }
  func.func @transform_11(%arg0: i32, %arg1: i32) -> (i32, i32, i32) {
    %c0_i32 = arith.constant 0 : i32
    %c0_i32_0 = arith.constant 0 : i32
    %c0_i32_1 = arith.constant 0 : i32
    return %arg1, %c0_i32, %c0_i32_0 : i32, i32, i32
  }
  func.func @transform_12(%arg0: i32, %arg1: i32) -> (i32, i32, i32) {
    %c0_i32 = arith.constant 0 : i32
    %c0_i32_0 = arith.constant 0 : i32
    %c0_i32_1 = arith.constant 0 : i32
    return %arg1, %c0_i32, %c0_i32_0 : i32, i32, i32
  }
  func.func @transform_13(%arg0: i32, %arg1: i32) -> (i32, i32) {
    %c0_i32 = arith.constant 0 : i32
    %c0_i32_0 = arith.constant 0 : i32
    return %arg0, %c0_i32 : i32, i32
  }
}

</mosaic_0001>

<bundles_post_ra>
// kernel: tpu_custom_call.1
= control target key start
LH: loop header
LB: loop body
LE: loop exit
PB: predicated region body
PF: predicated region fallthrough
CT: control target
= control target key end

     0   :  { %s2693_s0 = inlined_call_operand.vmem [shape: f32[16,32], index: 0, kind: input, shape index: {}]   ;;  %s2694_s1 = inlined_call_operand.vmem [shape: f32[2,1,32], index: 1, kind: input, shape index: {}]   ;;  %s2695_s2 = inlined_call_operand.hbm [shape: f32[2,1,32], index: 2, kind: input, shape index: {}]   ;;  %s2696_s3 = inlined_call_operand.vmem [shape: f32[2,32,8], index: 3, kind: input, shape index: {}]   ;;  %s2697_s4 = inlined_call_operand.vmem [shape: f32[2,32,1], index: 4, kind: input, shape index: {}]   ;;  %s2698_s5 = inlined_call_operand.hbm [shape: f32[2,8,32], index: 5, kind: input, shape index: {}]   ;;  %s2699_s6 = inlined_call_operand.vmem [shape: f32[2,8,1], index: 6, kind: input, shape index: {}]   ;;  %s2700_s7 = inlined_call_operand.vmem [shape: f32[2,1,32], index: 7, kind: input, shape index: {}]   ;;  %s2701_s8 = inlined_call_operand.vmem [shape: f32[2,1,32], index: 8, kind: input, shape index: {}]   ;;  %s2702_s9 = inlined_call_operand.vmem [shape: f32[2,32,32], index: 9, kind: input, shape index: {}]   ;;  %s2703_s10 = inlined_call_operand.vmem [shape: f32[2,1,32], index: 10, kind: input, shape index: {}]   ;;  %s2704_s11 = inlined_call_operand.vmem [shape: f32[2,32,32], index: 11, kind: input, shape index: {}]   ;;  %s2705_s12 = inlined_call_operand.vmem [shape: f32[2,1,32], index: 12, kind: input, shape index: {}]   ;;  %s2706_s13 = inlined_call_operand.hbm [shape: f32[16,32], index: 13, kind: output, shape index: {}]  }
   0x1   :  { %2714 = sst [smem:[#allocation18_spill]] %s2693_s0 }
   0x2   :  { %2715 = sst [smem:[#allocation19_spill]] %s2695_s2 }
   0x3   :  { %2716 = sst [smem:[#allocation20_spill]] %s2696_s3 }
   0x4   :  { %2717 = sst [smem:[#allocation21_spill]] %s2697_s4 }
   0x5   :  { %2718 = sst [smem:[#allocation22_spill]] %s2698_s5 }
   0x6   :  { %2719 = sst [smem:[#allocation23_spill]] %s2706_s13 }
   0x7   :  { %18 = vsyncpa [#allocation4], 0 }
   0x8   :  { %20 = vsyncpa [#allocation4 + $0x1], 0 }
   0x9   :  { %21 = vsyncpa [#allocation7], 0 }
   0xa   :  { %23 = vsyncpa [#allocation7 + $0x1], 0 }
   0xb   :  { %24 = vsyncpa [#allocation5], 0  ;;  %s2107_s25 = smov 0   ;;  %s2109_s26 = smov 0  }
   0xc   :  { %s2111_s27 = smov 0   ;;  %s2113_s28 = smov 0  }
   0xd   :  { %s2115_s29 = smov 0   ;;  %s2117_s30 = smov 0  }
   0xe LB: > { %2720 = sst [smem:[#allocation12_spill]] %s2014_s26  ;;  %s2708_s14 = sadd.s32 4294967295, %s2030_s30   ;;  %s2030_s30 = sphi %s2117_s30, %s30_s30   ;;  %s2026_s29 = sphi %s2115_s29, %s2753_s29   ;;  %s2022_s28 = sphi %s2113_s28, %s2752_s28   ;;  %s2018_s27 = sphi %s2111_s27, %s2751_s27   ;;  %s2014_s26 = sphi %s2109_s26, %s2750_s26   ;;  %s2010_s25 = sphi %s2107_s25, %s2749_s25  }
   0xf   : > { %2721 = sst [smem:[#allocation13_spill]] %s2018_s27  ;;  %s39_s15 = sadd.s32 1, %s2026_s29 }
  0x10   : > { %2722 = sst [smem:[#allocation14_spill]] %s2026_s29  ;;  %p40_p0 = scmp.ge.s32.totalorder %s39_s15, 2 }
  0x11   : > { %2723 = sst [smem:[#allocation15_spill]] %s2030_s30  ;;  %s101_s16 = sadd.s32 1, %s2018_s27 }
  0x12   : > { %p108_p1 = scmp.ne.s32.totalorder %s2018_s27, %s2014_s26  ;;  %p109_p2 = scmp.eq.s32.totalorder %s2030_s30, 0 }
  0x13   : > { %s2755_s15 = smov (%p40_p0, %s39_s15), 0  ;;  %p114_p4 = scmp.ne.s32.totalorder %s2014_s26, %s2010_s25 }
  0x14   : > { %2724 = sst [smem:[#allocation16_spill]] %s2755_s15  ;;  %p2143_p3 = por %p109_p2, %p108_p1 }
  0x15   : > { %s98_s18 = ssub.s32 %s2026_s29, %s2755_s15  ;;  %p115_p5 = scmp.eq.s32.totalorder %s2708_s14, 0 }
  0x16   : > { %p99_p6 = scmp.eq.s32.totalorder %s98_s18, 0  ;;  %p1789_p8 = scmp.lt.s32.totalorder %s2030_s30, 2 }
  0x17   : > { %p2152_p7 = por %p115_p5, %p114_p4  ;;  %s439_s21 = sand.u32 1, %s2018_s27  }
  0x18   : > { %s2158_s20 = scalar_select %p99_p6, %s2018_s27, %s101_s16  }
  0x19   : > { %s2728_s2 = sld [smem:[#allocation19_spill]]  ;;  %s442_s25 = scalar_lea.vmem [#allocation3], %s439_s21 }
  0x1a   : > { %2727 = sst [smem:[#allocation17_spill]] %s2158_s20  ;;  %s449_s0 = sshll.u32 %s442_s25, 4  ;;  %s450_s0 = int_to_ptr.vmem [resolvable:$true] %s449_s0 }
  0x1b   : > { %p2167_p9 = pnand %p1789_p8, %p2143_p3  ;;  %p1729_p10 = scmp.ge.s32.totalorder %s2030_s30, 1 }
  0x1c   : > { %p536_p11 = scmp.lt.s32.totalorder %s2030_s30, 3  ;;  %s1727_s16 = sshll.u32 %s439_s21, 3 }
  0x1d   : > { %s440_s14 = scalar_lea.sflag [#allocation4], %s439_s21  ;;  %s1728_s22 = sshll.u32 %s2026_s29, 3 }
  0x1e   : > { %p537_p12 = pnand %p1729_p10, %p536_p11  ;;  %s476_s23 = scalar_lea.vmem [#allocation6], %s1727_s16 }
  0x1f   : > { %s445_s24 = scalar_lea.hbm %s2728_s2, %s2026_s29  ;;  %s2730_s5 = sld [smem:[#allocation22_spill]] }
  0x20   : > { %s447_s13 = sshll.u32 %s445_s24, 4  ;;  %s484_s24 = sshll.u32 %s476_s23, 4  ;;  %s448_s13 = int_to_ptr.hbm [resolvable:$true] %s447_s13  ;;  %s485_s24 = int_to_ptr.vmem [resolvable:$true] %s484_s24 }
  0x21   : > { %1785 = dma.hbm_to_vmem [thread:$0]  (!%p2167_p9), %s448_s13, 16, %s450_s0, %s440_s14  }
  0x22   : > { %s473_s20 = scalar_lea.sflag [#allocation7], %s439_s21  ;;  %s2182_s27 = sand.u32 (!%p537_p12), 1, %s2014_s26  }
  0x23   : > { %540 = sbr.rel (%p537_p12) target bundleno = 1090 (0x442), region = 72  ;;  %s543_s0 = scalar_lea.sflag (!%p537_p12), [#allocation4], %s2182_s27 }
  0x25   : > { %s480_s17 = scalar_lea.hbm %s2730_s5, %s1728_s22 }
  0x26   : > { %s482_s15 = sshll.u32 %s480_s17, 4  ;;  %s483_s15 = int_to_ptr.hbm [resolvable:$true] %s482_s15 }
  0x27   : > { %1788 = dma.hbm_to_vmem [thread:$0]  (!%p2167_p9), %s483_s15, 128, %s485_s24, %s473_s20  }
  0x28   : > { %1997 = dma.done.wait (%p2152_p7), %s543_s0, 16  }
  0x29   : > { %1999 = vsyncadd (%p2152_p7), %s543_s0, 4294967280  ;;  %s1730_s2 = sshll.u32 %s2182_s27, 3  ;;  %s552_s14 = scalar_lea.sflag [#allocation7], %s2182_s27 }
  0x2a   : > { %s2192_s15 = scalar_lea.vmem [#allocation6], %s1730_s2 }
  0x2b   : > { %2001 = dma.done.wait (%p2152_p7), %s552_s14, 128  }
  0x2c   : > { %2003 = vsyncadd (%p2152_p7), %s552_s14, 4294967168  ;;  %p648_p13 = scmp.lt.s32.totalorder %s2022_s28, 1  ;;  %s2731_s3 = sld [smem:[#allocation20_spill]] }
  0x2d   : > { %s2732_s4 = sld [smem:[#allocation21_spill]]  ;;  %p1740_p0 = scmp.ne.s32.totalorder %s2022_s28, 0 }
  0x2e   : > { %s2200_s20 = scalar_select %p648_p13, %s2022_s28, 1 }
  0x2f   : > { %s2733_s29 = sld [smem:[#allocation18_spill]] (!%p1740_p0) }
  0x30   : > { %s1770_s22 = sshll.u32 %s2200_s20, 5  ;;  %s1735_s2 = sshll.u32 %s2200_s20, 3 }
  0x31   : > { %s2225_s16 = scalar_lea.vmem %s2699_s6, %s1735_s2  ;;  %s2234_s25 = scalar_lea.vmem %s2702_s9, %s1770_s22 }
  0x32   : > { %s2210_s24 = scalar_lea.vmem %s2731_s3, %s1770_s22  ;;  %s678_s30 = scalar_lea.vmem %s2703_s10, %s2200_s20 }
  0x33   : > { %s2215_s0 = scalar_lea.vmem %s2732_s4, %s1770_s22  ;;  %s2243_s18 = scalar_lea.vmem %s2704_s11, %s1770_s22 }
  0x34   : > { %s686_s2 = scalar_lea.vmem %s2705_s12, %s2200_s20  ;;  %691 = sbr.rel (%p1740_p0) target bundleno = 60 (0x3c), region = 84 }
  0x35   : > { %s2734_s19 = smov (!%p1740_p0), %s2733_s29 }
  0x39   : > { %v692_v0 = vld [vmem:[%s2733_s29] sm:$0xff]  ;;  %vm694_vm0 = vcmask 261120   ;;  %v693_v1 = vld [vmem:[%s2734_s19 + $0x8] sm:$0xff] }
  0x3a   : > { %695 = vst.msk [vmem:[#allocation2] sm:$0xff] %vm694_vm0, %v692_v0 }
  0x3b   : > { %696 = vst.msk [vmem:[#allocation2 + $0x8] sm:$0xff] %vm694_vm0, %v693_v1 }
  0x3c PF: > { %vm710_vm1 = vcmask 261120   ;;  %v2032_v10 = vmov 32.0   ;;  %v703_v31 = vld [vmem:[%s2215_s0] sm:$0xff]  ;;  %v2033_v32 = vmov 0   ;;  %v704_v39 = vld [vmem:[%s2215_s0 + $0x8] sm:$0xff]  ;;  %s2735_s17 = scalar_lea.vmem %s2694_s1, %s2200_s20  ;;  %s2736_s14 = scalar_lea.vmem [#allocation3], %s2182_s27 }
  0x3d   : > { %1854 = vrcp.f32 %v2032_v10  ;;  %1847 = vset.pattern.permute.xlu1 %v2033_v32  ;;  %1846 = vset.pattern.permute.xlu0 %v2033_v32  ;;  %v1848_v47 = vld [vmem:[%s2735_s17] ss:$0 sm:$0xff]  ;;  %v706_v53 = vld [vmem:[%s2215_s0 + $0x18] sm:$0xff]  ;;  %vm770_vm9 = vcmask 64512   ;;  %v705_v60 = vld [vmem:[%s2215_s0 + $0x10] sm:$0xff]  ;;  %s2744_s21 = scalar_lea.vmem %s2701_s8, %s2200_s20  ;;  %p1765_p1 = scmp.ne.s32.totalorder %s2022_s28, 1 }
  0x3e   : > { %1845 = vset.pattern.permute.xlu2 %v2033_v32  ;;  %v1849_v51 = vld [vmem:[%s2736_s14] ss:$0 sm:$0xff]  ;;  %v700_v61 = vld [vmem:[%s2210_s24 + $0x8] sm:$0xff]  ;;  %v701_v63 = vld [vmem:[%s2210_s24 + $0x10] sm:$0xff] }
  0x3f   : > { %767 = vperm.xlu2 %1845, %v706_v53   ;;  %v699_v58 = vld [vmem:[%s2210_s24] sm:$0xff]  ;;  %v702_v0 = vld [vmem:[%s2210_s24 + $0x18] sm:$0xff] }
  0x40   : > { %v708_v62 = vld [vmem:[%s2225_s16] sm:$0xff]  ;;  %s2743_s16 = scalar_lea.vmem %s2700_s7, %s2200_s20 }
  0x41   : > { %v2258_v3 = vld [vmem:[#allocation2] sm:$0xff] }
  0x42   : > { %v2256_v2 = vld [vmem:[#allocation2 + $0x8] sm:$0xff]  ;;  %v711_v5 = vsel %vm710_vm1, %v2258_v3, 0.0  ;;  %v722_v7 = vmul.f32 %v2258_v3, %v2258_v3 }
  0x43   : > { %v1020_v4 = vsel %vm710_vm1, %v2256_v2, 0.0  ;;  %712 = vadd.xlane.f32.xlu1 %v711_v5  ;;  %v1024_v6 = vmul.f32 %v2256_v2, %v2256_v2  ;;  %v1855_v11 = vpop.eup %1854 }
  0x44   : > { %1021 = vadd.xlane.f32.xlu0 %v1020_v4  ;;  %v723_v9 = vsel %vm710_vm1, %v722_v7, 0.0  ;;  %v715_v12 = vmul.f32 32.0, %v1855_v11  ;;  %vm719_vm2 = vweird.f32 %v1855_v11 }
  0x45   : > { %v1025_v8 = vsel %vm710_vm1, %v1024_v6, 0.0 }
  0x46   : > { %v716_v13 = vsub.f32 1.0, %v715_v12 }
  0x47   : > { %762 = vperm.xlu2 %1845, %v705_v60  }
  0x48   : > { %v717_v14 = vmul.f32 %v1855_v11, %v716_v13 }
  0x4a   : > { %v718_v15 = vadd.f32 %v1855_v11, %v717_v14 }
  0x4b   : > { %724 = vadd.xlane.f32.xlu1 %v723_v9 }
  0x4c   : > { %1026 = vadd.xlane.f32.xlu0 %v1025_v8  ;;  %v2270_v18 = vsel %vm719_vm2, %v1855_v11, %v718_v15 }
  0x4f   : > { %990 = vperm.xlu2 %1845, %v708_v62  }
  0x60   : > { %757 = vperm.xlu0 %1846, %v704_v39  }
  0x64   : > { %752 = vperm.xlu1 %1847, %v703_v31  }
  0x99   : > { %v768_v9 = vpop.permute.xlu2 %767 }
  0xb6   : > { %v713_v17 = vpop.xlane.xlu1 %712 }
  0xb7   : > { %v1022_v16 = vpop.xlane.xlu0 %1021  ;;  %v721_v20 = vmul.f32 %v2270_v18, %v713_v17 }
  0xb8   : > { %v1023_v19 = vmul.f32 %v1022_v16, %v2270_v18 }
  0xb9   : > { %v727_v24 = vmul.f32 %v721_v20, %v721_v20  ;;  %v729_v48 = vsub.f32 %v2258_v3, %v721_v20 }
  0xba   : > { %v1029_v23 = vmul.f32 %v1023_v19, %v1023_v19  ;;  %v1031_v45 = vsub.f32 %v2256_v2, %v1023_v19 }
  0xbe   : > { %v725_v22 = vpop.xlane.xlu1 %724 }
  0xbf   : > { %v1027_v21 = vpop.xlane.xlu0 %1026  ;;  %v726_v26 = vmul.f32 %v725_v22, %v2270_v18 }
  0xc0   : > { %v1028_v25 = vmul.f32 %v1027_v21, %v2270_v18 }
  0xc1   : > { %v728_v28 = vsub.f32 %v726_v26, %v727_v24 }
  0xc2   : > { %v1030_v27 = vsub.f32 %v1028_v25, %v1029_v23  ;;  %v763_v23 = vpop.permute.xlu2 %762 }
  0xc3   : > { %v730_v30 = vadd.f32 1e-05, %v728_v28 }
  0xc4   : > { %v1032_v29 = vadd.f32 1e-05, %v1030_v27 }
  0xc5   : > { %vm737_vm6 = vweird.f32 %v730_v30 }
  0xc6   : > { %1856 = vrsqrt.f32 %v1032_v29  ;;  %vm1039_vm5 = vweird.f32 %v1032_v29 }
  0xc7   : > { %1858 = vrsqrt.f32 %v730_v30 }
  0xcc   : > { %v1857_v33 = vpop.eup %1856 }
  0xcd   : > { %v1859_v34 = vpop.eup %1858  ;;  %v1034_v35 = vmul.f32 %v1857_v33, %v1032_v29  ;;  %vm1040_vm3 = vweird.f32 %v1857_v33 }
  0xce   : > { %v732_v36 = vmul.f32 %v1859_v34, %v730_v30  ;;  %vm738_vm4 = vweird.f32 %v1859_v34  ;;  %vm1041_vm7 = vmor %vm1039_vm5, %vm1040_vm3 }
  0xcf   : > { %v1035_v37 = vmul.f32 %v1857_v33, %v1034_v35  ;;  %vm739_vm8 = vmor %vm737_vm6, %vm738_vm4 }
  0xd0   : > { %v733_v38 = vmul.f32 %v1859_v34, %v732_v36 }
  0xd1   : > { %v1036_v40 = vmul.f32 0.5, %v1035_v37 }
  0xd2   : > { %v734_v41 = vmul.f32 0.5, %v733_v38  ;;  %v758_v10 = vpop.permute.xlu0 %757 }
  0xd3   : > { %v1037_v42 = vsub.f32 1.5, %v1036_v40 }
  0xd4   : > { %v735_v43 = vsub.f32 1.5, %v734_v41 }
  0xd5   : > { %v1038_v44 = vmul.f32 %v1857_v33, %v1037_v42 }
  0xd6   : > { %v736_v46 = vmul.f32 %v1859_v34, %v735_v43  ;;  %v753_v1 = vpop.permute.xlu1 %752 }
  0xd7   : > { %v1042_v49 = vsel %vm1041_vm7, %v1857_v33, %v1038_v44 }
  0xd8   : > { %v740_v50 = vsel %vm739_vm8, %v1859_v34, %v736_v46  ;;  %v1043_v52 = vmul.f32 %v1042_v49, %v1031_v45 }
  0xd9   : > { %v741_v54 = vmul.f32 %v740_v50, %v729_v48 }
  0xda   : > { %v1044_v55 = vmul.f32 %v1848_v47, %v1043_v52 }
  0xdb   : > { %v745_v56 = vmul.f32 %v1848_v47, %v741_v54 }
  0xdc   : > { %v1045_v57 = vadd.f32 %v1849_v51, %v1044_v55 }
  0xdd   : > { %v749_v59 = vadd.f32 %v1849_v51, %v745_v56 }
  0xde   : > { %1061 = vmatpush.msra.mxu2 %v1045_v57 }
  0xdf   : > { %798 = vmatpush.msra.mxu0 %v749_v59  ;;  %1750 = vmatmul.msk.f32.vlgmr.msra.gmra.mxu2 %vm770_vm9, %v699_v58 }
  0xe0   : > { %1741 = vmatmul.msk.f32.vlgmr.msra.gmra.mxu0 %vm770_vm9, %v699_v58 }
  0xe7   : > { %1751 = vmatmul.msk.f32.gmra.mxu2 %vm770_vm9, %v700_v61 }
  0xe8   : > { %1742 = vmatmul.msk.f32.gmra.mxu0 %vm770_vm9, %v700_v61 }
  0xef   : > { %1752 = vmatmul.msk.f32.gmra.mxu2 %vm770_vm9, %v701_v63 }
  0xf0   : > { %1743 = vmatmul.msk.f32.gmra.mxu0 %vm770_vm9, %v701_v63 }
  0xf7   : > { %1753 = vmatmul.msk.f32.gmra.mxu2 %vm770_vm9, %v702_v0 }
  0xf8   : > { %1744 = vmatmul.msk.f32.gmra.mxu0 %vm770_vm9, %v702_v0 }
 0x15d   : > { %v800_v4 = vpop.f32.mrf.mxu0 }
 0x15e   : > { %v2302_v5 = vadd.f32 %v800_v4, %v753_v1 }
 0x160   : > { %v2305_v6 = vmul.f32 0.70710677, %v2302_v5 }
 0x162   : > { %v820_v7 = vmul.f32 %v2305_v6, %v2305_v6  ;;  %v1063_v8 = vpop.f32.mrf.mxu2 }
 0x163   : > { %v2317_v16 = vadd.f32 %v1063_v8, %v753_v1 }
 0x164   : > { %v2309_v11 = vmin.f32 %v820_v7, 16.0 }
 0x165   : > { %v803_v12 = vpop.f32.mrf.mxu0  ;;  %v2324_v22 = vmul.f32 0.70710677, %v2317_v16 }
 0x166   : > { %v2311_v13 = vadd.f32 %v803_v12, %v758_v10  ;;  %v822_v15 = vmul.f32 2.1237322e-06, %v2309_v11  ;;  %v833_v25 = vmul.f32 3.8918573e-05, %v2309_v11 }
 0x167   : > { %v1083_v30 = vmul.f32 %v2324_v22, %v2324_v22 }
 0x168   : > { %v2314_v14 = vmul.f32 0.70710677, %v2311_v13  ;;  %v823_v21 = vadd.f32 0.00028619796, %v822_v15  ;;  %v834_v32 = vadd.f32 0.001143296, %v833_v25 }
 0x169   : > { %v2343_v39 = vmin.f32 %v1083_v30, 16.0 }
 0x16a   : > { %v860_v17 = vmul.f32 %v2314_v14, %v2314_v14  ;;  %v1066_v19 = vpop.f32.mrf.mxu2  ;;  %v824_v29 = vmul.f32 %v823_v21, %v2309_v11  ;;  %v835_v42 = vmul.f32 %v834_v32, %v2309_v11 }
 0x16b   : > { %v2336_v33 = vadd.f32 %v1066_v19, %v758_v10  ;;  %v1085_v52 = vmul.f32 2.1237322e-06, %v2343_v39 }
 0x16c   : > { %v2321_v20 = vmin.f32 %v860_v17, 16.0  ;;  %v825_v38 = vadd.f32 0.0036580483, %v824_v29  ;;  %v836_v54 = vadd.f32 0.014752088, %v835_v42 }
 0x16d   : > { %v806_v24 = vpop.f32.mrf.mxu0  ;;  %v2349_v43 = vmul.f32 0.70710677, %v2336_v33  ;;  %v1086_v1 = vadd.f32 0.00028619796, %v1085_v52 }
 0x16e   : > { %v862_v26 = vmul.f32 2.1237322e-06, %v2321_v20  ;;  %v2328_v27 = vadd.f32 %v806_v24, %v763_v23  ;;  %v873_v50 = vmul.f32 3.8918573e-05, %v2321_v20  ;;  %v826_v51 = vmul.f32 %v825_v38, %v2309_v11 }
 0x16f   : > { %v1123_v55 = vmul.f32 %v2349_v43, %v2349_v43  ;;  %v837_v7 = vmul.f32 %v836_v54, %v2309_v11 }
 0x170   : > { %v863_v28 = vadd.f32 0.00028619796, %v862_v26  ;;  %v2334_v31 = vmul.f32 0.70710677, %v2328_v27  ;;  %v874_v63 = vadd.f32 0.001143296, %v873_v50 }
 0x171   : > { %v827_v0 = vadd.f32 0.05243302, %v826_v51  ;;  %v2378_v8 = vmin.f32 %v1123_v55, 16.0  ;;  %v838_v29 = vadd.f32 0.112945676, %v837_v7 }
 0x172   : > { %v1069_v34 = vpop.f32.mrf.mxu2  ;;  %v864_v35 = vmul.f32 %v863_v28, %v2321_v20  ;;  %v900_v36 = vmul.f32 %v2334_v31, %v2334_v31  ;;  %v875_v25 = vmul.f32 %v874_v63, %v2321_v20 }
 0x173   : > { %v2341_v37 = vadd.f32 %v1069_v34, %v763_v23  ;;  %v828_v30 = vmul.f32 %v827_v0, %v2309_v11  ;;  %v1125_v32 = vmul.f32 2.1237322e-06, %v2378_v8  ;;  %v839_v54 = vmul.f32 %v838_v29, %v2309_v11 }
 0x174   : > { %v2345_v40 = vmin.f32 %v900_v36, 16.0  ;;  %v865_v46 = vadd.f32 0.0036580483, %v864_v35  ;;  %v1087_v36 = vmul.f32 %v1086_v1, %v2343_v39  ;;  %v876_v50 = vadd.f32 0.014752088, %v875_v25 }
 0x175   : > { %v809_v41 = vpop.f32.mrf.mxu0  ;;  %v2352_v44 = vmul.f32 0.70710677, %v2341_v37  ;;  %v829_v55 = vadd.f32 0.18741608, %v828_v30 }
 0x176   : > { %v2354_v45 = vadd.f32 %v809_v41, %v768_v9  ;;  %v902_v47 = vmul.f32 2.1237322e-06, %v2345_v40  ;;  %v866_v58 = vmul.f32 %v865_v46, %v2321_v20  ;;  %v913_v19 = vmul.f32 3.8918573e-05, %v2345_v40 }
 0x177   : > { %v1163_v48 = vmul.f32 %v2352_v44, %v2352_v44 }
 0x178   : > { %v2360_v49 = vmul.f32 0.70710677, %v2354_v45  ;;  %v903_v53 = vadd.f32 0.00028619796, %v902_v47  ;;  %v867_v15 = vadd.f32 0.05243302, %v866_v58  ;;  %v877_v58 = vmul.f32 %v876_v50, %v2321_v20 }
 0x179   : > { %v2373_v61 = vmin.f32 %v1163_v48, 16.0  ;;  %v914_v42 = vadd.f32 0.001143296, %v913_v19 }
 0x17a   : > { %v940_v56 = vmul.f32 %v2360_v49, %v2360_v49  ;;  %v1072_v57 = vpop.f32.mrf.mxu2  ;;  %v904_v59 = vmul.f32 %v903_v53, %v2345_v40  ;;  %v868_v38 = vmul.f32 %v867_v15, %v2321_v20  ;;  %v878_v15 = vadd.f32 0.112945676, %v877_v58 }
 0x17b   : > { %v2371_v60 = vadd.f32 %v1072_v57, %v768_v9  ;;  %v1165_v21 = vmul.f32 2.1237322e-06, %v2373_v61  ;;  %v915_v53 = vmul.f32 %v914_v42, %v2345_v40 }
 0x17c   : > { %v2375_v62 = vmin.f32 %v940_v56, 16.0  ;;  %v905_v4 = vadd.f32 0.0036580483, %v904_v59  ;;  %v1126_v56 = vadd.f32 0.00028619796, %v1125_v32 }
 0x17d   : > { %v2382_v12 = vmul.f32 0.70710677, %v2371_v60  ;;  %v1166_v47 = vadd.f32 0.00028619796, %v1165_v21  ;;  %v1088_v59 = vadd.f32 0.0036580483, %v1087_v36 }
 0x17e   : > { %v942_v10 = vmul.f32 2.1237322e-06, %v2375_v62  ;;  %v906_v9 = vmul.f32 %v905_v4, %v2345_v40  ;;  %v953_v17 = vmul.f32 3.8918573e-05, %v2375_v62  ;;  %v869_v63 = vadd.f32 0.18741608, %v868_v38 }
 0x17f   : > { %v1203_v24 = vmul.f32 %v2382_v12, %v2382_v12  ;;  %v916_v1 = vadd.f32 0.014752088, %v915_v53  ;;  %v1167_v7 = vmul.f32 %v1166_v47, %v2373_v61  ;;  %v840_v21 = vadd.f32 0.4994258, %v839_v54 }
 0x180   : > { %v943_v23 = vadd.f32 0.00028619796, %v942_v10  ;;  %v907_v26 = vadd.f32 0.05243302, %v906_v9  ;;  %v954_v28 = vadd.f32 0.001143296, %v953_v17 }
 0x181   : > { %v2394_v35 = vmin.f32 %v1203_v24, 16.0  ;;  %v917_v19 = vmul.f32 %v916_v1, %v2345_v40  ;;  %v1127_v24 = vmul.f32 %v1126_v56, %v2378_v8  ;;  %v841_v32 = vmul.f32 %v840_v21, %v2309_v11 }
 0x182   : > { %v944_v34 = vmul.f32 %v943_v23, %v2375_v62  ;;  %v955_v41 = vmul.f32 %v954_v28, %v2375_v62  ;;  %v908_v46 = vmul.f32 %v907_v26, %v2345_v40  ;;  %v830_v23 = vmul.f32 %v829_v55, %v2309_v11 }
 0x183   : > { %v1205_v51 = vmul.f32 2.1237322e-06, %v2394_v35  ;;  %v879_v26 = vmul.f32 %v878_v15, %v2321_v20  ;;  %v870_v28 = vmul.f32 %v869_v63, %v2321_v20  ;;  %v918_v30 = vadd.f32 0.112945676, %v917_v19 }
 0x184   : > { %v945_v48 = vadd.f32 0.0036580483, %v944_v34  ;;  %v956_v52 = vadd.f32 0.014752088, %v955_v41  ;;  %v909_v4 = vadd.f32 0.18741608, %v908_v46  ;;  %v2425_v56 = vmul.f32 %v1088_v59, %v2343_v39 }
 0x185   : > { %v1206_v9 = vadd.f32 0.00028619796, %v1205_v51  ;;  %v1168_v36 = vadd.f32 0.0036580483, %v1167_v7  ;;  %v880_v41 = vadd.f32 0.4994258, %v879_v26  ;;  %v919_v47 = vmul.f32 %v918_v30, %v2345_v40 }
 0x186   : > { %v946_v57 = vmul.f32 %v945_v48, %v2375_v62  ;;  %v957_v0 = vmul.f32 %v956_v52, %v2375_v62  ;;  %v910_v34 = vmul.f32 %v909_v4, %v2345_v40  ;;  %v2418_v48 = vadd.f32 1.0, %v841_v32 }
 0x187   : > { %v1207_v42 = vmul.f32 %v1206_v9, %v2394_v35  ;;  %v831_v50 = vadd.f32 1.1283791, %v830_v23  ;;  %v1128_v51 = vadd.f32 0.0036580483, %v1127_v24  ;;  %v881_v53 = vmul.f32 %v880_v41, %v2321_v20 }
 0x188   : > { %v947_v10 = vadd.f32 0.05243302, %v946_v57  ;;  %v958_v17 = vadd.f32 0.112945676, %v957_v0  ;;  %v871_v54 = vadd.f32 1.1283791, %v870_v28  ;;  %1860 = vrcp.f32 %v2418_v48 }
 0x189   : > { %v920_v55 = vadd.f32 0.4994258, %v919_v47  ;;  %v2428_v57 = vmul.f32 0.5, %v2311_v13  ;;  %v1169_v58 = vmul.f32 %v1168_v36, %v2373_v61  ;;  %v2431_v63 = vadd.f32 1.0, %v881_v53 }
 0x18a   : > { %v948_v25 = vmul.f32 %v947_v10, %v2375_v62  ;;  %v959_v29 = vmul.f32 %v958_v17, %v2375_v62  ;;  %v911_v0 = vadd.f32 1.1283791, %v910_v34  ;;  %v1208_v1 = vadd.f32 0.0036580483, %v1207_v42 }
 0x18b   : > { %v921_v20 = vmul.f32 %v920_v55, %v2345_v40  ;;  %v2440_v7 = vmul.f32 %v1128_v51, %v2378_v8  ;;  %1862 = vrcp.f32 %v2431_v63  ;;  %v2444_v13 = vmul.f32 %v871_v54, %v2314_v14 }
 0x18c   : > { %v949_v38 = vadd.f32 0.18741608, %v948_v25  ;;  %v960_v46 = vadd.f32 0.4994258, %v959_v29  ;;  %v2447_v10 = vmul.f32 0.5, %v2354_v45  ;;  %v854_v17 = vand.u32 2147483648, %v2418_v48 }
 0x18d   : > { %v2451_v40 = vadd.f32 0.05243302, %v1169_v58  ;;  %v852_v9 = vand.u32 2147483647, %v2418_v48  ;;  %v2458_v21 = vmul.f32 %v911_v0, %v2334_v31  ;;  %v2461_v14 = vmul.f32 %v1208_v1, %v2394_v35 }
 0x18e   : > { %v950_v52 = vmul.f32 %v949_v38, %v2375_v62  ;;  %v961_v11 = vmul.f32 %v960_v46, %v2375_v62  ;;  %v2437_v62 = vmul.f32 %v831_v50, %v2305_v6  ;;  %v2453_v6 = vadd.f32 1.0, %v921_v20  ;;  %v1861_v19 = vpop.eup %1860 }
 0x18f   : > { %v892_v45 = vand.u32 2147483647, %v2431_v63  ;;  %v894_v23 = vand.u32 2147483648, %v2431_v63  ;;  %vm848_vm10 = vweird.f32 %v2418_v48  ;;  %vm888_vm11 = vweird.f32 %v2431_v63 }
 0x190   : > { %v2433_v4 = vadd.f32 1.0, %v961_v11  ;;  %v951_v59 = vadd.f32 1.1283791, %v950_v52  ;;  %v934_v31 = vand.u32 2147483648, %v2453_v6  ;;  %v844_v28 = vmul.f32 %v1861_v19, %v2418_v48 }
 0x191   : > { %v1863_v29 = vpop.eup %1862  ;;  %v932_v30 = vand.u32 2147483647, %v2453_v6  ;;  %vm2476_vm13 = vcmp.eq.f32.partialorder %v852_v9, 8.507059e+37  ;;  %v855_v32 = vor.u32 1.1754944e-38, %v854_v17  ;;  %v1216_v34 = vmul.f32 3.8918573e-05, %v2394_v35 }
 0x192   : > { %1864 = vrcp.f32 %v2433_v4  ;;  %v974_v15 = vand.u32 2147483648, %v2433_v4  ;;  %v2466_v24 = vmul.f32 %v951_v59, %v2360_v49  ;;  %v972_v25 = vand.u32 2147483647, %v2433_v4 }
 0x193   : > { %1866 = vrcp.f32 %v2453_v6  ;;  %vm968_vm12 = vweird.f32 %v2433_v4  ;;  %v884_v38 = vmul.f32 %v1863_v29, %v2431_v63  ;;  %vm2482_vm14 = vcmp.eq.f32.partialorder %v892_v45, 8.507059e+37 }
 0x194   : > { %v975_v26 = vor.u32 1.1754944e-38, %v974_v15  ;;  %v895_v42 = vor.u32 1.1754944e-38, %v894_v23  ;;  %v845_v46 = vsub.f32 1.0, %v844_v28  ;;  %vm849_vm15 = vweird.f32 %v1861_v19 }
 0x195   : > { %vm2487_vm0 = vcmp.eq.f32.partialorder %v972_v25, 8.507059e+37  ;;  %v935_v51 = vor.u32 1.1754944e-38, %v934_v31  ;;  %v1217_v52 = vadd.f32 0.001143296, %v1216_v34  ;;  %v1176_v53 = vmul.f32 3.8918573e-05, %v2373_v61  ;;  %vm850_vm5 = vmor %vm848_vm10, %vm849_vm15 }
 0x196   : > { %vm928_vm2 = vweird.f32 %v2453_v6  ;;  %v885_v54 = vsub.f32 1.0, %v884_v38  ;;  %vm889_vm3 = vweird.f32 %v1863_v29  ;;  %v846_v11 = vmul.f32 %v1861_v19, %v845_v46 }
 0x197   : > { %v1136_v55 = vmul.f32 3.8918573e-05, %v2378_v8  ;;  %v1218_v1 = vmul.f32 %v1217_v52, %v2394_v35  ;;  %v1177_v20 = vadd.f32 0.001143296, %v1176_v53  ;;  %v1096_v17 = vmul.f32 3.8918573e-05, %v2343_v39  ;;  %vm890_vm7 = vmor %vm888_vm11, %vm889_vm3 }
 0x198   : > { %v1865_v36 = vpop.eup %1864  ;;  %v886_v15 = vmul.f32 %v1863_v29, %v885_v54  ;;  %v847_v9 = vadd.f32 %v1861_v19, %v846_v11  ;;  %vm933_vm10 = vcmp.eq.f32.partialorder %v932_v30, 8.507059e+37 }
 0x199   : > { %v964_v47 = vmul.f32 %v1865_v36, %v2433_v4  ;;  %v1867_v58 = vpop.eup %1866  ;;  %vm969_vm4 = vweird.f32 %v1865_v36  ;;  %v1219_v23 = vadd.f32 0.014752088, %v1218_v1  ;;  %v1178_v25 = vmul.f32 %v1177_v20, %v2373_v61 }
 0x19a   : > { %v924_v59 = vmul.f32 %v1867_v58, %v2453_v6  ;;  %v1137_v31 = vadd.f32 0.001143296, %v1136_v55  ;;  %vm929_vm6 = vweird.f32 %v1867_v58  ;;  %v887_v34 = vadd.f32 %v1863_v29, %v886_v15  ;;  %vm970_vm8 = vmor %vm968_vm12, %vm969_vm4 }
 0x19b   : > { %v965_v0 = vsub.f32 1.0, %v964_v47  ;;  %v851_v38 = vsel %vm850_vm5, %v1861_v19, %v847_v9  ;;  %v1220_v52 = vmul.f32 %v1219_v23, %v2394_v35  ;;  %v1179_v48 = vadd.f32 0.014752088, %v1178_v25  ;;  %vm930_vm9 = vmor %vm928_vm2, %vm929_vm6 }
 0x19c   : > { %v925_v28 = vsub.f32 1.0, %v924_v59  ;;  %v856_v47 = vsel %vm2476_vm13, %v855_v32, %v851_v38  ;;  %v891_v54 = vsel %vm890_vm7, %v1863_v29, %v887_v34  ;;  %v1138_v11 = vmul.f32 %v1137_v31, %v2378_v8 }
 0x19d   : > { %v966_v45 = vmul.f32 %v1865_v36, %v965_v0  ;;  %v1097_v19 = vadd.f32 0.001143296, %v1096_v17  ;;  %v896_v63 = vsel %vm2482_vm14, %v895_v42, %v891_v54  ;;  %v1221_v0 = vadd.f32 0.112945676, %v1220_v52 }
 0x19e   : > { %v926_v53 = vmul.f32 %v1867_v58, %v925_v28  ;;  %v1180_v49 = vmul.f32 %v1179_v48, %v2373_v61  ;;  %v897_v20 = vmul.f32 %v896_v63, %v2444_v13  ;;  %v857_v4 = vmul.f32 %v856_v47, %v2437_v62 }
 0x19f   : > { %v967_v46 = vadd.f32 %v1865_v36, %v966_v45  ;;  %v1139_v42 = vadd.f32 0.014752088, %v1138_v11  ;;  %v1210_v59 = vadd.f32 0.05243302, %v2461_v14  ;;  %v1098_v13 = vmul.f32 %v1097_v19, %v2343_v39 }
 0x1a0   : > { %v927_v1 = vadd.f32 %v1867_v58, %v926_v53  ;;  %v1181_v41 = vadd.f32 0.112945676, %v1180_v49  ;;  %v1746_v17 = vclamps-f32 %v897_v20, 1.0  ;;  %v1745_v45 = vclamps-f32 %v857_v4, 1.0 }
 0x1a1   : > { %v971_v55 = vsel %vm970_vm8, %v1865_v36, %v967_v46  ;;  %v1222_v36 = vmul.f32 %v1221_v0, %v2394_v35  ;;  %v1140_v23 = vmul.f32 %v1139_v42, %v2378_v8  ;;  %v1099_v31 = vadd.f32 0.014752088, %v1098_v13 }
 0x1a2   : > { %v976_v32 = vsel %vm2487_vm0, %v975_v26, %v971_v55  ;;  %v931_v15 = vsel %vm930_vm9, %v1867_v58, %v927_v1  ;;  %v814_v6 = vmul.f32 0.5, %v2328_v27  ;;  %v1211_v30 = vmul.f32 %v1210_v59, %v2394_v35 }
 0x1a3   : > { %v977_v29 = vmul.f32 %v976_v32, %v2466_v24  ;;  %v936_v62 = vsel %vm933_vm10, %v935_v51, %v931_v15  ;;  %v1223_v50 = vadd.f32 0.4994258, %v1222_v36  ;;  %v1182_v24 = vmul.f32 %v1181_v41, %v2373_v61 }
 0x1a4   : > { %v937_v9 = vmul.f32 %v936_v62, %v2458_v21  ;;  %v1141_v51 = vadd.f32 0.112945676, %v1140_v23  ;;  %v1100_v46 = vmul.f32 %v1099_v31, %v2343_v39  ;;  %v1090_v47 = vadd.f32 0.05243302, %v2425_v56 }
 0x1a5   : > { %v1748_v26 = vclamps-f32 %v977_v29, 1.0  ;;  %v1224_v14 = vmul.f32 %v1223_v50, %v2394_v35  ;;  %v1183_v58 = vadd.f32 0.4994258, %v1182_v24  ;;  %v981_v48 = vadd.f32 1.0, %v1746_v17  ;;  %v2554_v29 = vld [vmem:[%s2192_s15] sm:$0xff] }
 0x1a6   : > { %v1747_v28 = vclamps-f32 %v937_v9, 1.0  ;;  %v1142_v53 = vmul.f32 %v1141_v51, %v2378_v8  ;;  %v1130_v27 = vadd.f32 0.05243302, %v2440_v7  ;;  %v1171_v54 = vmul.f32 %v2451_v40, %v2373_v61 }
 0x1a7   : > { %v983_v25 = vadd.f32 1.0, %v1748_v26  ;;  %v2534_v38 = vadd.f32 1.0, %v1224_v14  ;;  %v1184_v21 = vmul.f32 %v1183_v58, %v2373_v61  ;;  %v980_v11 = vadd.f32 1.0, %v1745_v45 }
 0x1a8   : > { %v982_v52 = vadd.f32 1.0, %v1747_v28  ;;  %v1143_v55 = vadd.f32 0.4994258, %v1142_v53  ;;  %v1101_v63 = vadd.f32 0.112945676, %v1100_v46  ;;  %v812_v0 = vmul.f32 0.5, %v2302_v5 }
 0x1a9   : > { %v987_v34 = vmul.f32 %v983_v25, %v2447_v10  ;;  %1868 = vrcp.f32 %v2534_v38  ;;  %v2544_v19 = vadd.f32 1.0, %v1184_v21  ;;  %v1212_v56 = vadd.f32 0.18741608, %v1211_v30 }
 0x1aa   : > { %v986_v10 = vmul.f32 %v982_v52, %v814_v6  ;;  %v1091_v49 = vmul.f32 %v1090_v47, %v2343_v39  ;;  %v985_v7 = vmul.f32 %v981_v48, %v2428_v57  ;;  %v1131_v40 = vmul.f32 %v1130_v27, %v2378_v8 }
 0x1ab   : > { %1008 = vmatpush.msra.mxu1 %v987_v34  ;;  %1870 = vrcp.f32 %v2544_v19  ;;  %v1172_v32 = vadd.f32 0.18741608, %v1171_v54  ;;  %v1144_v1 = vmul.f32 %v1143_v55, %v2378_v8  ;;  %v1102_v20 = vmul.f32 %v1101_v63, %v2343_v39 }
 0x1ac   : > { %v984_v4 = vmul.f32 %v980_v11, %v812_v0  ;;  %v1213_v5 = vmul.f32 %v1212_v56, %v2394_v35  ;;  %v1092_v59 = vadd.f32 0.18741608, %v1091_v49  ;;  %v1132_v15 = vadd.f32 0.18741608, %v1131_v40 }
 0x1ad   : > { %1009 = vmatpush.msra.mxu1 %v986_v10  ;;  %v2557_v41 = vadd.f32 1.0, %v1144_v1  ;;  %v1103_v42 = vadd.f32 0.4994258, %v1102_v20  ;;  %v1173_v13 = vmul.f32 %v1172_v32, %v2373_v61  ;;  %v2566_v35 = vmul.f32 0.5, %v2341_v37 }
 0x1ae   : > { %v1214_v24 = vadd.f32 1.1283791, %v1213_v5  ;;  %v1237_v9 = vand.u32 2147483648, %v2534_v38  ;;  %v1235_v61 = vand.u32 2147483647, %v2534_v38  ;;  %v1093_v25 = vmul.f32 %v1092_v59, %v2343_v39 }
 0x1af   : > { %1010 = vmatpush.msra.mxu1 %v985_v7  ;;  %v1869_v36 = vpop.eup %1868  ;;  %1872 = vrcp.f32 %v2557_v41  ;;  %v1104_v50 = vmul.f32 %v1103_v42, %v2343_v39  ;;  %v1133_v14 = vmul.f32 %v1132_v15, %v2378_v8  ;;  %v1174_v58 = vadd.f32 1.1283791, %v1173_v13 }
 0x1b0   : > { %v1227_v57 = vmul.f32 %v1869_v36, %v2534_v38  ;;  %vm1232_vm11 = vweird.f32 %v1869_v36  ;;  %vm1231_vm12 = vweird.f32 %v2534_v38  ;;  %v1197_v37 = vand.u32 2147483648, %v2544_v19 }
 0x1b1   : > { %1011 = vmatpush.msra.mxu1 %v984_v4  ;;  %v1871_v26 = vpop.eup %1870  ;;  %v2571_v23 = vadd.f32 1.0, %v1104_v50  ;;  %vm1233_vm13 = vmor %vm1231_vm12, %vm1232_vm11  ;;  %v1238_v28 = vor.u32 1.1754944e-38, %v1237_v9  ;;  %v1195_v34 = vand.u32 2147483647, %v2544_v19  ;;  %v1215_v39 = vmul.f32 %v1214_v24, %v2382_v12 }
 0x1b2   : > { %1749 = vmatmul.msk.f32.vlgmr.msra.gmra.mxu1 %vm710_vm1, %v2554_v29  ;;  %v1228_v62 = vsub.f32 1.0, %v1227_v57  ;;  %v1187_v17 = vmul.f32 %v1871_v26, %v2544_v19  ;;  %vm1192_vm14 = vweird.f32 %v1871_v26  ;;  %vm1236_vm15 = vcmp.eq.f32.partialorder %v1235_v61, 8.507059e+37 }
 0x1b3   : > { %1874 = vrcp.f32 %v2571_v23  ;;  %v1134_v46 = vadd.f32 1.1283791, %v1133_v14  ;;  %vm1191_vm0 = vweird.f32 %v2544_v19  ;;  %v1175_v52 = vmul.f32 %v1174_v58, %v2352_v44 }
 0x1b4   : > { %v1229_v45 = vmul.f32 %v1869_v36, %v1228_v62  ;;  %v1188_v31 = vsub.f32 1.0, %v1187_v17  ;;  %vm1193_vm2 = vmor %vm1191_vm0, %vm1192_vm14  ;;  %v1198_v53 = vor.u32 1.1754944e-38, %v1197_v37  ;;  %vm1196_vm3 = vcmp.eq.f32.partialorder %v1195_v34, 8.507059e+37 }
 0x1b5   : > { %v1873_v30 = vpop.eup %1872  ;;  %v1155_v11 = vand.u32 2147483647, %v2557_v41  ;;  %v1157_v12 = vand.u32 2147483648, %v2557_v41  ;;  %v1094_v0 = vadd.f32 1.1283791, %v1093_v25  ;;  %v1135_v19 = vmul.f32 %v1134_v46, %v2349_v43 }
 0x1b6   : > { %v1230_v6 = vadd.f32 %v1869_v36, %v1229_v45  ;;  %v1189_v51 = vmul.f32 %v1871_v26, %v1188_v31  ;;  %v1147_v8 = vmul.f32 %v1873_v30, %v2557_v41  ;;  %vm1152_vm4 = vweird.f32 %v1873_v30 }
 0x1b7   : > { %v1078_v7 = vmul.f32 0.5, %v2371_v60  ;;  %vm1151_vm5 = vweird.f32 %v2557_v41  ;;  %vm1156_vm7 = vcmp.eq.f32.partialorder %v1155_v11, 8.507059e+37  ;;  %v1158_v20 = vor.u32 1.1754944e-38, %v1157_v12 }
 0x1b8   : > { %v1234_v21 = vsel %vm1233_vm13, %v1869_v36, %v1230_v6  ;;  %v1190_v38 = vadd.f32 %v1871_v26, %v1189_v51  ;;  %v1148_v27 = vsub.f32 1.0, %v1147_v8  ;;  %vm1153_vm6 = vmor %vm1151_vm5, %vm1152_vm4  ;;  %v1115_v42 = vand.u32 2147483647, %v2571_v23 }
 0x1b9   : > { %v1239_v47 = vsel %vm1236_vm15, %v1238_v28, %v1234_v21  ;;  %v1875_v10 = vpop.eup %1874  ;;  %v1117_v43 = vand.u32 2147483648, %v2571_v23  ;;  %vm1111_vm9 = vweird.f32 %v2571_v23  ;;  %v1095_v50 = vmul.f32 %v1094_v0, %v2324_v22  ;;  %v991_v22 = vpop.permute.xlu2 %990  ;;  %v1338_v0 = vld [vmem:[%s2234_s25 + $0x18] sm:$0xff] }
 0x1ba   : > { %v1240_v48 = vmul.f32 %v1239_v47, %v1215_v39  ;;  %v1194_v54 = vsel %vm1193_vm2, %v1871_v26, %v1190_v38  ;;  %v1149_v56 = vmul.f32 %v1873_v30, %v1148_v27  ;;  %v1107_v44 = vmul.f32 %v1875_v10, %v2571_v23  ;;  %1361 = vmatpush.msrb.mxu1 %v1338_v0 }
 0x1bb   : > { %v1199_v63 = vsel %vm1196_vm3, %v1198_v53, %v1194_v54  ;;  %vm1112_vm8 = vweird.f32 %v1875_v10  ;;  %v1118_v62 = vor.u32 1.1754944e-38, %v1117_v43  ;;  %vm1116_vm11 = vcmp.eq.f32.partialorder %v1115_v42, 8.507059e+37 }
 0x1bc   : > { %v1757_v55 = vclamps-f32 %v1240_v48, 1.0  ;;  %v1200_v49 = vmul.f32 %v1199_v63, %v1175_v52  ;;  %v1150_v32 = vadd.f32 %v1873_v30, %v1149_v56  ;;  %v1108_v4 = vsub.f32 1.0, %v1107_v44  ;;  %vm1113_vm10 = vmor %vm1111_vm9, %vm1112_vm8  ;;  %v1850_v44 = vld [vmem:[%s2743_s16] ss:$0 sm:$0xff] }
 0x1bd   : > { %v1076_v9 = vmul.f32 0.5, %v2336_v33 }
 0x1be   : > { %v1246_v40 = vadd.f32 1.0, %v1757_v55  ;;  %v1756_v1 = vclamps-f32 %v1200_v49, 1.0  ;;  %v1154_v5 = vsel %vm1153_vm6, %v1873_v30, %v1150_v32  ;;  %v1109_v15 = vmul.f32 %v1875_v10, %v1108_v4 }
 0x1bf   : > { %v1159_v59 = vsel %vm1156_vm7, %v1158_v20, %v1154_v5 }
 0x1c0   : > { %v1250_v36 = vmul.f32 %v1246_v40, %v1078_v7  ;;  %v1245_v57 = vadd.f32 1.0, %v1756_v1  ;;  %v1160_v60 = vmul.f32 %v1159_v59, %v1135_v19  ;;  %v1110_v41 = vadd.f32 %v1875_v10, %v1109_v15  ;;  %v1337_v19 = vld [vmem:[%s2234_s25 + $0x10] sm:$0xff]  ;;  %v1851_v7 = vld [vmem:[%s2744_s21] ss:$0 sm:$0xff]  ;;  %v1336_v40 = vld [vmem:[%s2234_s25 + $0x8] sm:$0xff] }
 0x1c1   : > { %1362 = vmatpush.msrb.mxu1 %v1337_v19  ;;  %v1335_v1 = vld [vmem:[%s2234_s25] sm:$0xff] }
 0x1c2   : > { %1263 = vmatpush.msra.mxu3 %v1250_v36  ;;  %v1249_v13 = vmul.f32 %v1245_v57, %v2566_v35  ;;  %v1755_v26 = vclamps-f32 %v1160_v60, 1.0  ;;  %v1114_v24 = vsel %vm1113_vm10, %v1875_v10, %v1110_v41  ;;  %v1075_v35 = vmul.f32 0.5, %v2317_v16 }
 0x1c3   : > { %v1119_v45 = vsel %vm1116_vm11, %v1118_v62, %v1114_v24  ;;  %1363 = vmatpush.msrb.mxu1 %v1336_v40 }
 0x1c4   : > { %1264 = vmatpush.msra.mxu3 %v1249_v13  ;;  %v1244_v17 = vadd.f32 1.0, %v1755_v26  ;;  %v1120_v61 = vmul.f32 %v1119_v45, %v1095_v50 }
 0x1c5   : > { %1364 = vmatpush.msrb.mxu1 %v1335_v1 }
 0x1c6   : > { %v1248_v25 = vmul.f32 %v1244_v17, %v1076_v9  ;;  %v1754_v14 = vclamps-f32 %v1120_v61, 1.0 }
 0x1c8   : > { %1265 = vmatpush.msra.mxu3 %v1248_v25  ;;  %v1243_v58 = vadd.f32 1.0, %v1754_v14 }
 0x1ca   : > { %v1247_v23 = vmul.f32 %v1243_v58, %v1075_v35 }
 0x1cc   : > { %1266 = vmatpush.msra.mxu3 %v1247_v23 }
 0x1cd   : > { %1758 = vmatmul.msk.f32.vlgmr.msra.gmra.mxu3 %vm710_vm1, %v2554_v29 }
 0x22f   : > { %v1013_v31 = vpop.f32.mrf.mxu1 }
 0x230   : > { %v1014_v6 = vadd.f32 %v1013_v31, %v991_v22 }
 0x232   : > { %v1016_v37 = vadd.f32 %v1014_v6, %v2258_v3 }
 0x234   : > { %1017 = vst.msk [vmem:[#allocation2] sm:$0xff] %vm710_vm1, %v1016_v37 }
 0x23b   : > { %v2600_v33 = vld [vmem:[#allocation2] sm:$0xff] }
 0x23c   : > { %v1277_v30 = vsel %vm710_vm1, %v2600_v33, 0.0  ;;  %v1285_v16 = vmul.f32 %v2600_v33, %v2600_v33 }
 0x23d   : > { %1278 = vadd.xlane.f32.xlu2 %v1277_v30 }
 0x23e   : > { %v1287_v28 = vsel %vm710_vm1, %v1285_v16, 0.0 }
 0x23f   : > { %1288 = vadd.xlane.f32.xlu1 %v1287_v28 }
 0x250   : > { %v1268_v29 = vpop.f32.mrf.mxu3 }
 0x251   : > { %v1269_v51 = vadd.f32 %v1268_v29, %v991_v22 }
 0x253   : > { %v1271_v34 = vadd.f32 %v1269_v51, %v2256_v2 }
 0x255   : > { %1272 = vst.msk [vmem:[#allocation2 + $0x8] sm:$0xff] %vm710_vm1, %v1271_v34 }
 0x25c   : > { %v2609_v3 = vld [vmem:[#allocation2 + $0x8] sm:$0xff] }
 0x25d   : > { %v1280_v39 = vsel %vm710_vm1, %v2609_v3, 0.0  ;;  %v1286_v21 = vmul.f32 %v2609_v3, %v2609_v3 }
 0x25e   : > { %1281 = vadd.xlane.f32.xlu0 %v1280_v39 }
 0x25f   : > { %v1290_v8 = vsel %vm710_vm1, %v1286_v21, 0.0 }
 0x260   : > { %1291 = vadd.xlane.f32.xlu2 %v1290_v8 }
 0x2b0   : > { %v1279_v46 = vpop.xlane.xlu2 %1278 }
 0x2b1   : > { %v1283_v47 = vmul.f32 %v1279_v46, %v2270_v18 }
 0x2b2   : > { %v1289_v38 = vpop.xlane.xlu1 %1288 }
 0x2b3   : > { %v1295_v52 = vmul.f32 %v1283_v47, %v1283_v47  ;;  %v1293_v2 = vmul.f32 %v1289_v38, %v2270_v18  ;;  %v1299_v56 = vsub.f32 %v2600_v33, %v1283_v47 }
 0x2b5   : > { %v1297_v48 = vsub.f32 %v1293_v2, %v1295_v52 }
 0x2b7   : > { %v1301_v53 = vadd.f32 1e-05, %v1297_v48 }
 0x2b9   : > { %1876 = vrsqrt.f32 %v1301_v53  ;;  %vm1309_vm13 = vweird.f32 %v1301_v53 }
 0x2bf   : > { %v1877_v27 = vpop.eup %1876 }
 0x2c0   : > { %v1304_v54 = vmul.f32 %v1877_v27, %v1301_v53  ;;  %vm1310_vm12 = vweird.f32 %v1877_v27 }
 0x2c1   : > { %vm1311_vm14 = vmor %vm1309_vm13, %vm1310_vm12 }
 0x2c2   : > { %v1305_v11 = vmul.f32 %v1877_v27, %v1304_v54 }
 0x2c4   : > { %v1306_v12 = vmul.f32 0.5, %v1305_v11 }
 0x2c6   : > { %v1307_v10 = vsub.f32 1.5, %v1306_v12 }
 0x2c8   : > { %v1308_v55 = vmul.f32 %v1877_v27, %v1307_v10 }
 0x2ca   : > { %v1312_v63 = vsel %vm1311_vm14, %v1877_v27, %v1308_v55 }
 0x2cb   : > { %v1323_v49 = vmul.f32 %v1312_v63, %v1299_v56 }
 0x2cd   : > { %v1328_v32 = vmul.f32 %v1850_v44, %v1323_v49 }
 0x2cf   : > { %v1333_v20 = vadd.f32 %v1851_v7, %v1328_v32 }
 0x2d1   : > { %v1282_v4 = vpop.xlane.xlu0 %1281  ;;  %1759 = vmatmul.msk.f32.vlgmr.msrb.gmra.mxu1 %vm710_vm1, %v1333_v20 }
 0x2d2   : > { %v1284_v36 = vmul.f32 %v1282_v4, %v2270_v18 }
 0x2d3   : > { %v1292_v5 = vpop.xlane.xlu2 %1291 }
 0x2d4   : > { %v1296_v42 = vmul.f32 %v1284_v36, %v1284_v36  ;;  %v1294_v43 = vmul.f32 %v1292_v5, %v2270_v18  ;;  %v1300_v50 = vsub.f32 %v2609_v3, %v1284_v36  ;;  %v1852_v18 = vld [vmem:[%s678_s30] ss:$0 sm:$0xff] }
 0x2d6   : > { %v1298_v57 = vsub.f32 %v1294_v43, %v1296_v42 }
 0x2d8   : > { %v1302_v59 = vadd.f32 1e-05, %v1298_v57  ;;  %v1463_v57 = vld [vmem:[%s2243_s18 + $0x18] sm:$0xff] }
 0x2d9   : > { %1486 = vmatpush.msrb.mxu3 %v1463_v57 }
 0x2da   : > { %1878 = vrsqrt.f32 %v1302_v59  ;;  %vm1319_vm0 = vweird.f32 %v1302_v59 }
 0x2e0   : > { %v1879_v15 = vpop.eup %1878 }
 0x2e1   : > { %v1314_v60 = vmul.f32 %v1879_v15, %v1302_v59  ;;  %vm1320_vm15 = vweird.f32 %v1879_v15  ;;  %v1462_v59 = vld [vmem:[%s2243_s18 + $0x10] sm:$0xff] }
 0x2e2   : > { %vm1321_vm2 = vmor %vm1319_vm0, %vm1320_vm15  ;;  %1487 = vmatpush.msrb.mxu3 %v1462_v59 }
 0x2e3   : > { %v1315_v13 = vmul.f32 %v1879_v15, %v1314_v60 }
 0x2e5   : > { %v1316_v41 = vmul.f32 0.5, %v1315_v13 }
 0x2e7   : > { %v1317_v26 = vsub.f32 1.5, %v1316_v41  ;;  %v1461_v41 = vld [vmem:[%s2243_s18 + $0x8] sm:$0xff] }
 0x2e8   : > { %1488 = vmatpush.msrb.mxu3 %v1461_v41 }
 0x2e9   : > { %v1318_v62 = vmul.f32 %v1879_v15, %v1317_v26 }
 0x2eb   : > { %v1322_v24 = vsel %vm1321_vm2, %v1879_v15, %v1318_v62 }
 0x2ec   : > { %v1324_v9 = vmul.f32 %v1322_v24, %v1300_v50  ;;  %v1460_v24 = vld [vmem:[%s2243_s18] sm:$0xff] }
 0x2ed   : > { %1489 = vmatpush.msrb.mxu3 %v1460_v24 }
 0x2ee   : > { %v1329_v17 = vmul.f32 %v1850_v44, %v1324_v9 }
 0x2f0   : > { %v1334_v45 = vadd.f32 %v1851_v7, %v1329_v17 }
 0x2f2   : > { %1760 = vmatmul.msk.f32.gmra.mxu1 %vm710_vm1, %v1334_v45 }
 0x34e   : > { %v1366_v61 = vpop.f32.mrf.mxu1 }
 0x34f   : > { %v1367_v25 = vadd.f32 %v1852_v18, %v1366_v61 }
 0x351   : > { %v1374_v14 = vmul.f32 0.70710677, %v1367_v25  ;;  %v1372_v26 = vmul.f32 0.5, %v1367_v25 }
 0x353   : > { %v1376_v35 = vmul.f32 %v1374_v14, %v1374_v14 }
 0x355   : > { %v1377_v58 = vmin.f32 %v1376_v35, 16.0 }
 0x357   : > { %v1378_v23 = vmul.f32 2.1237322e-06, %v1377_v58  ;;  %v1389_v22 = vmul.f32 3.8918573e-05, %v1377_v58 }
 0x359   : > { %v1379_v31 = vadd.f32 0.00028619796, %v1378_v23  ;;  %v1390_v6 = vadd.f32 0.001143296, %v1389_v22 }
 0x35b   : > { %v1380_v37 = vmul.f32 %v1379_v31, %v1377_v58  ;;  %v1391_v30 = vmul.f32 %v1390_v6, %v1377_v58 }
 0x35d   : > { %v1381_v16 = vadd.f32 0.0036580483, %v1380_v37  ;;  %v1392_v28 = vadd.f32 0.014752088, %v1391_v30 }
 0x35f   : > { %v1393_v29 = vmul.f32 %v1392_v28, %v1377_v58  ;;  %v1382_v51 = vmul.f32 %v1381_v16, %v1377_v58 }
 0x361   : > { %v1394_v34 = vadd.f32 0.112945676, %v1393_v29  ;;  %v1383_v21 = vadd.f32 0.05243302, %v1382_v51 }
 0x363   : > { %v1395_v39 = vmul.f32 %v1394_v34, %v1377_v58  ;;  %v1384_v47 = vmul.f32 %v1383_v21, %v1377_v58 }
 0x365   : > { %v1396_v8 = vadd.f32 0.4994258, %v1395_v39  ;;  %v1385_v52 = vadd.f32 0.18741608, %v1384_v47 }
 0x367   : > { %v1397_v46 = vmul.f32 %v1396_v8, %v1377_v58  ;;  %v1386_v27 = vmul.f32 %v1385_v52, %v1377_v58 }
 0x369   : > { %v1398_v38 = vadd.f32 1.0, %v1397_v46  ;;  %v1387_v55 = vadd.f32 1.1283791, %v1386_v27 }
 0x36b   : > { %1880 = vrcp.f32 %v1398_v38  ;;  %v1410_v63 = vand.u32 2147483648, %v1398_v38  ;;  %v1408_v0 = vand.u32 2147483647, %v1398_v38  ;;  %vm1404_vm4 = vweird.f32 %v1398_v38 }
 0x36c   : > { %v1388_v40 = vmul.f32 %v1387_v55, %v1374_v14 }
 0x36d   : > { %v1411_v32 = vor.u32 1.1754944e-38, %v1410_v63  ;;  %vm1409_vm6 = vcmp.eq.f32.partialorder %v1408_v0, 8.507059e+37 }
 0x36f   : > { %v1369_v2 = vpop.f32.mrf.mxu1 }
 0x370   : > { %v2643_v48 = vadd.f32 %v1852_v18, %v1369_v2 }
 0x371   : > { %v1881_v53 = vpop.eup %1880 }
 0x372   : > { %v1400_v54 = vmul.f32 %v1881_v53, %v1398_v38  ;;  %v2646_v11 = vmul.f32 0.70710677, %v2643_v48  ;;  %vm1405_vm3 = vweird.f32 %v1881_v53  ;;  %v1373_v38 = vmul.f32 0.5, %v2643_v48 }
 0x373   : > { %vm1406_vm5 = vmor %vm1404_vm4, %vm1405_vm3 }
 0x374   : > { %v1401_v12 = vsub.f32 1.0, %v1400_v54  ;;  %v1416_v10 = vmul.f32 %v2646_v11, %v2646_v11 }
 0x376   : > { %v1402_v56 = vmul.f32 %v1881_v53, %v1401_v12  ;;  %v1417_v19 = vmin.f32 %v1416_v10, 16.0 }
 0x378   : > { %v1403_v49 = vadd.f32 %v1881_v53, %v1402_v56  ;;  %v1418_v44 = vmul.f32 2.1237322e-06, %v1417_v19  ;;  %v1429_v7 = vmul.f32 3.8918573e-05, %v1417_v19 }
 0x37a   : > { %v1407_v1 = vsel %vm1406_vm5, %v1881_v53, %v1403_v49  ;;  %v1419_v20 = vadd.f32 0.00028619796, %v1418_v44  ;;  %v1430_v4 = vadd.f32 0.001143296, %v1429_v7  ;;  %v1853_v53 = vld [vmem:[%s686_s2] ss:$0 sm:$0xff] }
 0x37b   : > { %v1412_v36 = vsel %vm1409_vm6, %v1411_v32, %v1407_v1 }
 0x37c   : > { %v1413_v5 = vmul.f32 %v1412_v36, %v1388_v40  ;;  %v1420_v42 = vmul.f32 %v1419_v20, %v1417_v19  ;;  %v1431_v43 = vmul.f32 %v1430_v4, %v1417_v19 }
 0x37e   : > { %v1761_v15 = vclamps-f32 %v1413_v5, 1.0  ;;  %v1432_v60 = vadd.f32 0.014752088, %v1431_v43  ;;  %v1421_v13 = vadd.f32 0.0036580483, %v1420_v42 }
 0x380   : > { %v1456_v62 = vadd.f32 1.0, %v1761_v15  ;;  %v1433_v50 = vmul.f32 %v1432_v60, %v1417_v19  ;;  %v1422_v45 = vmul.f32 %v1421_v13, %v1417_v19 }
 0x382   : > { %v1458_v9 = vmul.f32 %v1456_v62, %v1372_v26  ;;  %v1434_v17 = vadd.f32 0.112945676, %v1433_v50  ;;  %v1423_v14 = vadd.f32 0.05243302, %v1422_v45 }
 0x384   : > { %v1435_v18 = vmul.f32 %v1434_v17, %v1417_v19  ;;  %1763 = vmatmul.msk.f32.vlgmr.msrb.gmra.mxu3 %vm710_vm1, %v1458_v9  ;;  %v1424_v23 = vmul.f32 %v1423_v14, %v1417_v19 }
 0x386   : > { %v1436_v61 = vadd.f32 0.4994258, %v1435_v18  ;;  %v1425_v22 = vadd.f32 0.18741608, %v1424_v23 }
 0x388   : > { %v1437_v35 = vmul.f32 %v1436_v61, %v1417_v19  ;;  %v1426_v31 = vmul.f32 %v1425_v22, %v1417_v19 }
 0x38a   : > { %v1438_v58 = vadd.f32 1.0, %v1437_v35  ;;  %v1427_v16 = vadd.f32 1.1283791, %v1426_v31 }
 0x38c   : > { %1882 = vrcp.f32 %v1438_v58  ;;  %v1450_v30 = vand.u32 2147483648, %v1438_v58  ;;  %v1448_v29 = vand.u32 2147483647, %v1438_v58  ;;  %vm1444_vm8 = vweird.f32 %v1438_v58 }
 0x38d   : > { %v1428_v39 = vmul.f32 %v1427_v16, %v2646_v11 }
 0x38e   : > { %v1451_v34 = vor.u32 1.1754944e-38, %v1450_v30  ;;  %vm1449_vm10 = vcmp.eq.f32.partialorder %v1448_v29, 8.507059e+37 }
 0x392   : > { %v1883_v25 = vpop.eup %1882 }
 0x393   : > { %v1440_v6 = vmul.f32 %v1883_v25, %v1438_v58  ;;  %vm1445_vm7 = vweird.f32 %v1883_v25 }
 0x394   : > { %vm1446_vm9 = vmor %vm1444_vm8, %vm1445_vm7 }
 0x395   : > { %v1441_v37 = vsub.f32 1.0, %v1440_v6 }
 0x397   : > { %v1442_v28 = vmul.f32 %v1883_v25, %v1441_v37 }
 0x399   : > { %v1443_v51 = vadd.f32 %v1883_v25, %v1442_v28 }
 0x39b   : > { %v1447_v21 = vsel %vm1446_vm9, %v1883_v25, %v1443_v51 }
 0x39c   : > { %v1452_v8 = vsel %vm1449_vm10, %v1451_v34, %v1447_v21 }
 0x39d   : > { %v1453_v46 = vmul.f32 %v1452_v8, %v1428_v39 }
 0x39f   : > { %v1762_v47 = vclamps-f32 %v1453_v46, 1.0 }
 0x3a1   : > { %v1457_v52 = vadd.f32 1.0, %v1762_v47 }
 0x3a3   : > { %v1459_v2 = vmul.f32 %v1457_v52, %v1373_v38 }
 0x3a5   : > { %1764 = vmatmul.msk.f32.gmra.mxu3 %vm710_vm1, %v1459_v2 }
 0x407   : > { %v1491_v27 = vpop.f32.mrf.mxu3 }
 0x408   : > { %v1492_v54 = vadd.f32 %v1853_v53, %v1491_v27 }
 0x40a   : > { %v1497_v11 = vadd.f32 %v1492_v54, %v2600_v33 }
 0x40c   : > { %1499 = vst.msk [vmem:[#allocation2] sm:$0xff] %vm710_vm1, %v1497_v11 }
 0x428   : > { %v1494_v12 = vpop.f32.mrf.mxu3 }
 0x429   : > { %v1495_v10 = vadd.f32 %v1853_v53, %v1494_v12  ;;  %1504 = sbr.rel (%p1765_p1) target bundleno = 1078 (0x436), region = 88 }
 0x42b   : > { %v1498_v55 = vadd.f32 %v1495_v10, %v2609_v3 }
 0x42d   : > { %1500 = vst.msk [vmem:[#allocation2 + $0x8] sm:$0xff] %vm710_vm1, %v1498_v55 }
 0x42e   : > { %v1505_v48 = vld [vmem:[#allocation2] sm:$0xff] }
 0x42f   : > { %1507 = vst.msk [vmem:[#allocation8] sm:$0xff] %vm710_vm1, %v1505_v48 }
 0x434   : > { %v1506_v63 = vld [vmem:[#allocation2 + $0x8] sm:$0xff] }
 0x435   : > { %1508 = vst.msk [vmem:[#allocation8 + $0x8] sm:$0xff] %vm710_vm1, %v1506_v63 }
 0x436 PF: > { %s2745_s20 = sld [smem:[#allocation15_spill]]  ;;  %s2034_s4 = smov [#allocation8]  }
 0x437   : > { %s2747_s3 = sld [smem:[#allocation23_spill]]  ;;  %s1517_s22 = sshll.u32 %s2034_s4, 4  ;;  %s1518_s22 = int_to_ptr.vmem [resolvable:$true] %s1517_s22 }
 0x438   : > { %s2035_s28 = smov 128   ;;  %s2036_s23 = smov 8  }
 0x43c   : > { %s2746_s13 = sadd.s32 4294967295, %s2745_s20  }
 0x43d   : > { %p1790_p2 = scmp.eq.s32.totalorder %s2746_s13, 1  ;;  %s1519_s29 = sshll.u32 %s2747_s3, 4  ;;  %s1520_s29 = int_to_ptr.hbm [resolvable:$true] %s1519_s29 }
 0x43f   : > { %1779 = dma.vmem_to_hbm [thread:$0]  (%p1790_p2), %s1518_s22, 256, %s1520_s29, [#allocation5], %s2035_s28, %s2035_s28, %s2036_s23  }
 0x440   : > { %2005 = dma.done.wait (%p1790_p2), [#allocation5], 256  }
 0x441   : > { %2007 = vsyncadd (%p1790_p2), [#allocation5], 4294967040 }
 0x442 PF: > { %s2748_s17 = sld [smem:[#allocation15_spill]] }
 0x443   : > { %s2749_s25 = sld [smem:[#allocation12_spill]] }
 0x444   : > { %s2750_s26 = sld [smem:[#allocation13_spill]] }
 0x445   : > { %s2751_s27 = sld [smem:[#allocation17_spill]] }
 0x446   : > { %s2752_s28 = sld [smem:[#allocation14_spill]] }
 0x447   : > { %s2753_s29 = sld [smem:[#allocation16_spill]] }
 0x448   : > { %s30_s30 = sadd.s32 1, %s2748_s17  }
 0x449   : > { %p27_p3 = scmp.ge.s32.totalorder %s30_s30, 4  }
 0x44b   :  { %29 = sbr.rel (!%p27_p3) target bundleno = 14 (0xe), region = 165 }
 0x450   :  { %1536 = vsyncpa [#allocation4], 1 }
 0x451   :  { %1538 = vsyncpa [#allocation4 + $0x1], 1 }
 0x452   :  { %1539 = vsyncpa [#allocation7], 1 }
 0x453   :  { %1541 = vsyncpa [#allocation7 + $0x1], 1 }
 0x454   :  { %1542 = vsyncpa [#allocation5], 1 }
 0x455   :  { %1544 = vsyncpa [#allocation5 + $0x1], 1 }

</bundles_post_ra>
